<compile_context>
chip_gen: v6e
topology: v6e:2x2x1
jax: 0.10.0
libtpu: 0.0.40
codegen_flags: <defaults>
</compile_context>

<pallas_src>
import jax
import jax.numpy as jnp
from jax import lax
from jax.experimental import pallas as pl
from jax.experimental.pallas import tpu as pltpu

LANE = 128


def _rup(n, m=LANE):
    return ((n + m - 1) // m) * m


def _pad2(a, rows, cols):
    r, c = a.shape
    return jnp.pad(a, ((0, rows - r), (0, cols - c)))


# ---------------------------------------------------------------------------
# Fused Pallas kernel
# ---------------------------------------------------------------------------
def _gnn_fused_kernel(a0_ref, x_ref, w1_ref, b1_ref, ns0_ref, nd0_ref,
                      a1_ref, w2_ref, b2_ref, ns1_ref, nd1_ref,
                      src_ref, dst_ref, o_ref):
    """ReLU(nd*(A@((ns*X)@W))+b) twice, then per-edge <h_src, h_dst>.

    All matmuls f32 operands / f32 accumulation (portable + deterministic);
    elementwise epilogues f32.  Intermediates stay in VMEM/vregs.
    """
    f32 = jnp.float32

    # ---- GraphConv layer 1 -------------------------------------------------
    xs = x_ref[...] * ns0_ref[...]                                     # (N, Fi)
    xw = jnp.dot(xs, w1_ref[...], preferred_element_type=f32)          # (N, Fh)
    agg = jnp.dot(a0_ref[...], xw, preferred_element_type=f32)         # (N, Fh)
    h1 = jnp.maximum(agg * nd0_ref[...] + b1_ref[...], 0.0)

    # ---- GraphConv layer 2 -------------------------------------------------
    hs = h1 * ns1_ref[...]
    hw = jnp.dot(hs, w2_ref[...], preferred_element_type=f32)          # (N, Fo)
    agg2 = jnp.dot(a1_ref[...], hw, preferred_element_type=f32)
    h2 = jnp.maximum(agg2 * nd1_ref[...] + b2_ref[...], 0.0)           # (N, Fo)

    # ---- Edge scoring: score[e] = <h2[src[e]], h2[dst[e]]> -----------------
    # One-hot gather masks built in-kernel (only int32 indices come from HBM);
    # the gathers run on the MXU, the dot product is an elementwise product
    # plus a thin (1,Fo)x(Fo,E) contraction written lane-dense as (1, E_pad).
    e_pad = src_ref.shape[0]
    n_pad = h2.shape[0]
    fo_pad = h2.shape[1]
    col_ids = lax.broadcasted_iota(jnp.int32, (e_pad, n_pad), 1)
    ssel = (col_ids == src_ref[...]).astype(f32)                       # (E, N)
    dsel = (col_ids == dst_ref[...]).astype(f32)                       # (E, N)
    h_src = jnp.dot(ssel, h2, preferred_element_type=f32)              # (E, Fo)
    h_dst = jnp.dot(dsel, h2, preferred_element_type=f32)              # (E, Fo)
    prod = h_src * h_dst                                               # (E, Fo)
    ones_row = jnp.ones((1, fo_pad), f32)
    o_ref[...] = lax.dot_general(                                      # (1, E)
        ones_row, prod,
        dimension_numbers=(((1,), (1,)), ((), ())),
        preferred_element_type=f32)


# ---------------------------------------------------------------------------
# Wrapper
# ---------------------------------------------------------------------------
def _both_norms(adj):
    """DGL norm='both': src scale = out_deg^-1/2, dst scale = in_deg^-1/2.

    Degrees clamped to >= 1 (matches DGL; keeps zero-padded nodes finite)."""
    out_deg = jnp.clip(jnp.sum(adj, axis=0), 1.0, None)    # per src node
    in_deg = jnp.clip(jnp.sum(adj, axis=1), 1.0, None)     # per dst node
    return (out_deg ** -0.5)[:, None], (in_deg ** -0.5)[:, None]


@jax.jit
def gnn_rank_forward(edge_src, edge_dst, blocks, x, params):
    """blocks: [A0, A1] dense (dst x src) adjacencies over the same node set;
    x: (N, in_features).  Returns per-edge u_dot_v scores of shape (E, 1)."""
    (w1, b1), (w2, b2) = params
    a0, a1 = blocks

    n = a0.shape[0]
    e = int(edge_src.shape[0])
    f_in, f_hid, f_out = w1.shape[0], w1.shape[1], w2.shape[1]

    n_p, e_p = _rup(n), _rup(e)
    fi_p, fh_p, fo_p = _rup(f_in), _rup(f_hid), _rup(f_out)

    # Zero-pad to lane-dense shapes.  Padded nodes / features are zero rows
    # and columns, so they never contaminate real outputs (padded nodes end
    # up at relu(bias) but padded adjacency columns are zero and padded-edge
    # indices never match the in-kernel iota, so nothing leaks).
    a0_p = _pad2(a0.astype(jnp.float32), n_p, n_p)
    a1_p = _pad2(a1.astype(jnp.float32), n_p, n_p)
    x_p = _pad2(x.astype(jnp.float32), n_p, fi_p)
    w1_p = _pad2(w1.astype(jnp.float32), fi_p, fh_p)
    w2_p = _pad2(w2.astype(jnp.float32), fh_p, fo_p)
    b1_p = _pad2(b1.reshape(1, -1).astype(jnp.float32), 1, fh_p)
    b2_p = _pad2(b2.reshape(1, -1).astype(jnp.float32), 1, fo_p)

    ns0, nd0 = _both_norms(a0_p)
    ns1, nd1 = _both_norms(a1_p)

    # Padded int32 edge indices (padded edges get -1 -> all-zero one-hot row).
    src_col = jnp.full((e_p, 1), -1, jnp.int32).at[:e, 0].set(
        edge_src.astype(jnp.int32))
    dst_col = jnp.full((e_p, 1), -1, jnp.int32).at[:e, 0].set(
        edge_dst.astype(jnp.int32))

    operands = (a0_p, x_p, w1_p, b1_p, ns0, nd0,
                a1_p, w2_p, b2_p, ns1, nd1,
                src_col, dst_col)

    full = lambda shape: pl.BlockSpec(shape, lambda i: (0,) * len(shape))
    in_specs = [full(op.shape) for op in operands]

    flops = 2.0 * (n_p * fi_p * fh_p + n_p * n_p * fh_p +
                   n_p * fh_p * fo_p + n_p * n_p * fo_p +
                   2 * e_p * n_p * fo_p + e_p * fo_p)
    bytes_accessed = sum(int(op.size) * op.dtype.itemsize for op in operands)
    bytes_accessed += e_p * 4
    cost = pl.CostEstimate(flops=int(flops), transcendentals=0,
                           bytes_accessed=int(bytes_accessed))

    scores_row = pl.pallas_call(
        _gnn_fused_kernel,
        out_shape=jax.ShapeDtypeStruct((1, e_p), jnp.float32),
        grid=(1,),
        in_specs=in_specs,
        out_specs=full((1, e_p)),
        compiler_params=pltpu.CompilerParams(
            dimension_semantics=("arbitrary",)),
        cost_estimate=cost,
    )(*operands)

    return scores_row[0, :e].reshape(e, 1)


# ---------------------------------------------------------------------------
# Pure-JAX f32 reference (unpadded) for a sanity check
# ---------------------------------------------------------------------------
def _reference(edge_src, edge_dst, blocks, x, params):
    def conv(adj, h, w, b):
        out_deg = jnp.clip(jnp.sum(adj, axis=0), 1.0, None)
        in_deg = jnp.clip(jnp.sum(adj, axis=1), 1.0, None)
        hs = h * (out_deg ** -0.5)[:, None]
        agg = adj @ (hs @ w)
        return jax.nn.relu(agg * (in_deg ** -0.5)[:, None] + b)

    (w1, b1), (w2, b2) = params
    h = conv(blocks[0], x, w1, b1)
    h = conv(blocks[1], h, w2, b2)
    return jnp.sum(h[edge_src] * h[edge_dst], axis=-1, keepdims=True)


# ---------------------------------------------------------------------------
# Deterministic setup + run
# ---------------------------------------------------------------------------
if __name__ == "__main__":
    key = jax.random.PRNGKey(0)
    k_x, k_a0, k_a1, k_w1, k_b1, k_w2, k_b2, k_es, k_ed = jax.random.split(key, 9)

    N = 16                         # nodes (same node set for both blocks)
    IN_F, HID_F, OUT_F = 8, 16, 16
    E = 16                         # edges in the edge_subgraph

    x = jax.random.normal(k_x, (N, IN_F), dtype=jnp.float32)
    a0 = (jax.random.uniform(k_a0, (N, N)) < 0.3).astype(jnp.float32)
    a1 = (jax.random.uniform(k_a1, (N, N)) < 0.3).astype(jnp.float32)

    w1 = jax.random.normal(k_w1, (IN_F, HID_F), jnp.float32) * (2.0 / (IN_F + HID_F)) ** 0.5
    b1 = 0.1 * jax.random.normal(k_b1, (HID_F,), jnp.float32)   # nonzero bias test
    w2 = jax.random.normal(k_w2, (HID_F, OUT_F), jnp.float32) * (2.0 / (HID_F + OUT_F)) ** 0.5
    b2 = 0.1 * jax.random.normal(k_b2, (OUT_F,), jnp.float32)   # nonzero bias test

    edge_src = jax.random.randint(k_es, (E,), 0, N)
    edge_dst = jax.random.randint(k_ed, (E,), 0, N)

    params = [(w1, b1), (w2, b2)]
    scores = gnn_rank_forward(edge_src, edge_dst, [a0, a1], x, params)
    scores = jax.block_until_ready(scores)
    assert scores.shape == (E, 1)

    # f32 throughout -> tight tolerance.
    ref = _reference(edge_src, edge_dst, [a0, a1], x, params)
    err = float(jnp.max(jnp.abs(scores - ref)))
    scale = float(jnp.max(jnp.abs(ref))) + 1e-6
    assert err <= 1e-3 * scale + 1e-4, f"max abs err {err} (scale {scale})"

    print("KERNEL_OK")
</pallas_src>

<mosaic_0001>
module attributes {stable_mosaic.version = 11 : i64} {
  func.func @_gnn_fused_kernel(%arg0: i32, %arg1: memref<128x128xf32, #tpu.memory_space<vmem>>, %arg2: memref<128x128xf32, #tpu.memory_space<vmem>>, %arg3: memref<128x128xf32, #tpu.memory_space<vmem>>, %arg4: memref<1x128xf32, #tpu.memory_space<vmem>>, %arg5: memref<128x1xf32, #tpu.memory_space<vmem>>, %arg6: memref<128x1xf32, #tpu.memory_space<vmem>>, %arg7: memref<128x128xf32, #tpu.memory_space<vmem>>, %arg8: memref<128x128xf32, #tpu.memory_space<vmem>>, %arg9: memref<1x128xf32, #tpu.memory_space<vmem>>, %arg10: memref<128x1xf32, #tpu.memory_space<vmem>>, %arg11: memref<128x1xf32, #tpu.memory_space<vmem>>, %arg12: memref<128x1xi32, #tpu.memory_space<vmem>>, %arg13: memref<128x1xi32, #tpu.memory_space<vmem>>, %arg14: memref<1x128xf32, #tpu.memory_space<vmem>>) attributes {dimension_semantics = [#tpu.dimension_semantics<arbitrary>], iteration_bounds = array<i64: 1>, scalar_prefetch = 0 : i64, scratch_operands = 0 : i64, tpu.core_type = #tpu.core_type<tc>, window_params = [{pipeline_mode = #tpu.pipeline_mode<synchronous>, transform_indices = @transform_0, window_bounds = array<i64: 128, 128>}, {pipeline_mode = #tpu.pipeline_mode<synchronous>, transform_indices = @transform_1, window_bounds = array<i64: 128, 128>}, {pipeline_mode = #tpu.pipeline_mode<synchronous>, transform_indices = @transform_2, window_bounds = array<i64: 128, 128>}, {pipeline_mode = #tpu.pipeline_mode<synchronous>, transform_indices = @transform_3, window_bounds = array<i64: 1, 128>}, {pipeline_mode = #tpu.pipeline_mode<synchronous>, transform_indices = @transform_4, window_bounds = array<i64: 128, 1>}, {pipeline_mode = #tpu.pipeline_mode<synchronous>, transform_indices = @transform_5, window_bounds = array<i64: 128, 1>}, {pipeline_mode = #tpu.pipeline_mode<synchronous>, transform_indices = @transform_6, window_bounds = array<i64: 128, 128>}, {pipeline_mode = #tpu.pipeline_mode<synchronous>, transform_indices = @transform_7, window_bounds = array<i64: 128, 128>}, {pipeline_mode = #tpu.pipeline_mode<synchronous>, transform_indices = @transform_8, window_bounds = array<i64: 1, 128>}, {pipeline_mode = #tpu.pipeline_mode<synchronous>, transform_indices = @transform_9, window_bounds = array<i64: 128, 1>}, {pipeline_mode = #tpu.pipeline_mode<synchronous>, transform_indices = @transform_10, window_bounds = array<i64: 128, 1>}, {pipeline_mode = #tpu.pipeline_mode<synchronous>, transform_indices = @transform_11, window_bounds = array<i64: 128, 1>}, {pipeline_mode = #tpu.pipeline_mode<synchronous>, transform_indices = @transform_12, window_bounds = array<i64: 128, 1>}, {pipeline_mode = #tpu.pipeline_mode<synchronous>, transform_indices = @transform_13, window_bounds = array<i64: 1, 128>}]} {
    %c0 = arith.constant 0 : index
    %c0_0 = arith.constant 0 : index
    %0 = vector.load %arg2[%c0, %c0_0] : memref<128x128xf32, #tpu.memory_space<vmem>>, vector<128x128xf32>
    %c0_1 = arith.constant 0 : index
    %c0_2 = arith.constant 0 : index
    %1 = vector.load %arg5[%c0_1, %c0_2] : memref<128x1xf32, #tpu.memory_space<vmem>>, vector<128x1xf32>
    %2 = vector.broadcast %1 : vector<128x1xf32> to vector<128x128xf32>
    %3 = arith.mulf %0, %2 : vector<128x128xf32>
    %c0_3 = arith.constant 0 : index
    %c0_4 = arith.constant 0 : index
    %4 = vector.load %arg3[%c0_3, %c0_4] : memref<128x128xf32, #tpu.memory_space<vmem>>, vector<128x128xf32>
    %cst = arith.constant dense<0.000000e+00> : vector<128x128xf32>
    %5 = tpu.matmul %3, %4, %cst {dimension_numbers = #tpu.dot_dimension_numbers<[1], [0], [0], [1], [0, 0, 1, 1], [], []>} : vector<128x128xf32>, vector<128x128xf32>, vector<128x128xf32> -> vector<128x128xf32>
    %c0_5 = arith.constant 0 : index
    %c0_6 = arith.constant 0 : index
    %6 = vector.load %arg1[%c0_5, %c0_6] : memref<128x128xf32, #tpu.memory_space<vmem>>, vector<128x128xf32>
    %cst_7 = arith.constant dense<0.000000e+00> : vector<128x128xf32>
    %7 = tpu.matmul %6, %5, %cst_7 {dimension_numbers = #tpu.dot_dimension_numbers<[1], [0], [0], [1], [0, 0, 1, 1], [], []>} : vector<128x128xf32>, vector<128x128xf32>, vector<128x128xf32> -> vector<128x128xf32>
    %c0_8 = arith.constant 0 : index
    %c0_9 = arith.constant 0 : index
    %8 = vector.load %arg6[%c0_8, %c0_9] : memref<128x1xf32, #tpu.memory_space<vmem>>, vector<128x1xf32>
    %9 = vector.broadcast %8 : vector<128x1xf32> to vector<128x128xf32>
    %10 = arith.mulf %7, %9 : vector<128x128xf32>
    %c0_10 = arith.constant 0 : index
    %c0_11 = arith.constant 0 : index
    %11 = vector.load %arg4[%c0_10, %c0_11] : memref<1x128xf32, #tpu.memory_space<vmem>>, vector<1x128xf32>
    %12 = vector.broadcast %11 : vector<1x128xf32> to vector<128x128xf32>
    %13 = arith.addf %10, %12 : vector<128x128xf32>
    %cst_12 = arith.constant 0.000000e+00 : f32
    %14 = vector.broadcast %cst_12 : f32 to vector<128x128xf32>
    %15 = arith.maximumf %13, %14 : vector<128x128xf32>
    %c0_13 = arith.constant 0 : index
    %c0_14 = arith.constant 0 : index
    %16 = vector.load %arg10[%c0_13, %c0_14] : memref<128x1xf32, #tpu.memory_space<vmem>>, vector<128x1xf32>
    %17 = vector.broadcast %16 : vector<128x1xf32> to vector<128x128xf32>
    %18 = arith.mulf %15, %17 : vector<128x128xf32>
    %c0_15 = arith.constant 0 : index
    %c0_16 = arith.constant 0 : index
    %19 = vector.load %arg8[%c0_15, %c0_16] : memref<128x128xf32, #tpu.memory_space<vmem>>, vector<128x128xf32>
    %cst_17 = arith.constant dense<0.000000e+00> : vector<128x128xf32>
    %20 = tpu.matmul %18, %19, %cst_17 {dimension_numbers = #tpu.dot_dimension_numbers<[1], [0], [0], [1], [0, 0, 1, 1], [], []>} : vector<128x128xf32>, vector<128x128xf32>, vector<128x128xf32> -> vector<128x128xf32>
    %c0_18 = arith.constant 0 : index
    %c0_19 = arith.constant 0 : index
    %21 = vector.load %arg7[%c0_18, %c0_19] : memref<128x128xf32, #tpu.memory_space<vmem>>, vector<128x128xf32>
    %cst_20 = arith.constant dense<0.000000e+00> : vector<128x128xf32>
    %22 = tpu.matmul %21, %20, %cst_20 {dimension_numbers = #tpu.dot_dimension_numbers<[1], [0], [0], [1], [0, 0, 1, 1], [], []>} : vector<128x128xf32>, vector<128x128xf32>, vector<128x128xf32> -> vector<128x128xf32>
    %c0_21 = arith.constant 0 : index
    %c0_22 = arith.constant 0 : index
    %23 = vector.load %arg11[%c0_21, %c0_22] : memref<128x1xf32, #tpu.memory_space<vmem>>, vector<128x1xf32>
    %24 = vector.broadcast %23 : vector<128x1xf32> to vector<128x128xf32>
    %25 = arith.mulf %22, %24 : vector<128x128xf32>
    %c0_23 = arith.constant 0 : index
    %c0_24 = arith.constant 0 : index
    %26 = vector.load %arg9[%c0_23, %c0_24] : memref<1x128xf32, #tpu.memory_space<vmem>>, vector<1x128xf32>
    %27 = vector.broadcast %26 : vector<1x128xf32> to vector<128x128xf32>
    %28 = arith.addf %25, %27 : vector<128x128xf32>
    %cst_25 = arith.constant 0.000000e+00 : f32
    %29 = vector.broadcast %cst_25 : f32 to vector<128x128xf32>
    %30 = arith.maximumf %28, %29 : vector<128x128xf32>
    %31 = tpu.iota {dimensions = array<i32: 1>} : vector<128x128xi32>
    %c0_26 = arith.constant 0 : index
    %c0_27 = arith.constant 0 : index
    %32 = vector.load %arg12[%c0_26, %c0_27] : memref<128x1xi32, #tpu.memory_space<vmem>>, vector<128x1xi32>
    %33 = vector.broadcast %32 : vector<128x1xi32> to vector<128x128xi32>
    %34 = arith.cmpi eq, %31, %33 : vector<128x128xi32>
    %35 = arith.extui %34 : vector<128x128xi1> to vector<128x128xi32>
    %36 = arith.sitofp %35 : vector<128x128xi32> to vector<128x128xf32>
    %c0_28 = arith.constant 0 : index
    %c0_29 = arith.constant 0 : index
    %37 = vector.load %arg13[%c0_28, %c0_29] : memref<128x1xi32, #tpu.memory_space<vmem>>, vector<128x1xi32>
    %38 = vector.broadcast %37 : vector<128x1xi32> to vector<128x128xi32>
    %39 = arith.cmpi eq, %31, %38 : vector<128x128xi32>
    %40 = arith.extui %39 : vector<128x128xi1> to vector<128x128xi32>
    %41 = arith.sitofp %40 : vector<128x128xi32> to vector<128x128xf32>
    %cst_30 = arith.constant dense<0.000000e+00> : vector<128x128xf32>
    %42 = tpu.matmul %36, %30, %cst_30 {dimension_numbers = #tpu.dot_dimension_numbers<[1], [0], [0], [1], [0, 0, 1, 1], [], []>} : vector<128x128xf32>, vector<128x128xf32>, vector<128x128xf32> -> vector<128x128xf32>
    %cst_31 = arith.constant dense<0.000000e+00> : vector<128x128xf32>
    %43 = tpu.matmul %41, %30, %cst_31 {dimension_numbers = #tpu.dot_dimension_numbers<[1], [0], [0], [1], [0, 0, 1, 1], [], []>} : vector<128x128xf32>, vector<128x128xf32>, vector<128x128xf32> -> vector<128x128xf32>
    %44 = arith.mulf %42, %43 : vector<128x128xf32>
    %cst_32 = arith.constant 1.000000e+00 : f32
    %45 = vector.broadcast %cst_32 : f32 to vector<1x128xf32>
    %cst_33 = arith.constant dense<0.000000e+00> : vector<1x128xf32>
    %46 = tpu.matmul %45, %44, %cst_33 {dimension_numbers = #tpu.dot_dimension_numbers<[1], [1], [0], [0], [0, 0, 1, 0], [], []>} : vector<1x128xf32>, vector<128x128xf32>, vector<1x128xf32> -> vector<1x128xf32>
    %c0_34 = arith.constant 0 : index
    %c0_35 = arith.constant 0 : index
    %47 = vector.load %arg14[%c0_34, %c0_35] : memref<1x128xf32, #tpu.memory_space<vmem>>, vector<1x128xf32>
    tpu.vector_store %arg14[%c0_34, %c0_35], %46 {strides = array<i32>} : memref<1x128xf32, #tpu.memory_space<vmem>>, vector<1x128xf32>,
    return
  }
  func.func @transform_0(%arg0: i32) -> (i32, i32) {
    %c0_i32 = arith.constant 0 : i32
    %c0_i32_0 = arith.constant 0 : i32
    %c0_i32_1 = arith.constant 0 : i32
    return %c0_i32, %c0_i32_0 : i32, i32
  }
  func.func @transform_1(%arg0: i32) -> (i32, i32) {
    %c0_i32 = arith.constant 0 : i32
    %c0_i32_0 = arith.constant 0 : i32
    %c0_i32_1 = arith.constant 0 : i32
    return %c0_i32, %c0_i32_0 : i32, i32
  }
  func.func @transform_2(%arg0: i32) -> (i32, i32) {
    %c0_i32 = arith.constant 0 : i32
    %c0_i32_0 = arith.constant 0 : i32
    %c0_i32_1 = arith.constant 0 : i32
    return %c0_i32, %c0_i32_0 : i32, i32
  }
  func.func @transform_3(%arg0: i32) -> (i32, i32) {
    %c0_i32 = arith.constant 0 : i32
    %c0_i32_0 = arith.constant 0 : i32
    %c0_i32_1 = arith.constant 0 : i32
    return %c0_i32, %c0_i32_0 : i32, i32
  }
  func.func @transform_4(%arg0: i32) -> (i32, i32) {
    %c0_i32 = arith.constant 0 : i32
    %c0_i32_0 = arith.constant 0 : i32
    %c0_i32_1 = arith.constant 0 : i32
    return %c0_i32, %c0_i32_0 : i32, i32
  }
  func.func @transform_5(%arg0: i32) -> (i32, i32) {
    %c0_i32 = arith.constant 0 : i32
    %c0_i32_0 = arith.constant 0 : i32
    %c0_i32_1 = arith.constant 0 : i32
    return %c0_i32, %c0_i32_0 : i32, i32
  }
  func.func @transform_6(%arg0: i32) -> (i32, i32) {
    %c0_i32 = arith.constant 0 : i32
    %c0_i32_0 = arith.constant 0 : i32
    %c0_i32_1 = arith.constant 0 : i32
    return %c0_i32, %c0_i32_0 : i32, i32
  }
  func.func @transform_7(%arg0: i32) -> (i32, i32) {
    %c0_i32 = arith.constant 0 : i32
    %c0_i32_0 = arith.constant 0 : i32
    %c0_i32_1 = arith.constant 0 : i32
    return %c0_i32, %c0_i32_0 : i32, i32
  }
  func.func @transform_8(%arg0: i32) -> (i32, i32) {
    %c0_i32 = arith.constant 0 : i32
    %c0_i32_0 = arith.constant 0 : i32
    %c0_i32_1 = arith.constant 0 : i32
    return %c0_i32, %c0_i32_0 : i32, i32
  }
  func.func @transform_9(%arg0: i32) -> (i32, i32) {
    %c0_i32 = arith.constant 0 : i32
    %c0_i32_0 = arith.constant 0 : i32
    %c0_i32_1 = arith.constant 0 : i32
    return %c0_i32, %c0_i32_0 : i32, i32
  }
  func.func @transform_10(%arg0: i32) -> (i32, i32) {
    %c0_i32 = arith.constant 0 : i32
    %c0_i32_0 = arith.constant 0 : i32
    %c0_i32_1 = arith.constant 0 : i32
    return %c0_i32, %c0_i32_0 : i32, i32
  }
  func.func @transform_11(%arg0: i32) -> (i32, i32) {
    %c0_i32 = arith.constant 0 : i32
    %c0_i32_0 = arith.constant 0 : i32
    %c0_i32_1 = arith.constant 0 : i32
    return %c0_i32, %c0_i32_0 : i32, i32
  }
  func.func @transform_12(%arg0: i32) -> (i32, i32) {
    %c0_i32 = arith.constant 0 : i32
    %c0_i32_0 = arith.constant 0 : i32
    %c0_i32_1 = arith.constant 0 : i32
    return %c0_i32, %c0_i32_0 : i32, i32
  }
  func.func @transform_13(%arg0: i32) -> (i32, i32) {
    %c0_i32 = arith.constant 0 : i32
    %c0_i32_0 = arith.constant 0 : i32
    %c0_i32_1 = arith.constant 0 : i32
    return %c0_i32, %c0_i32_0 : i32, i32
  }
}

</mosaic_0001>

<bundles_post_ra>
// kernel: gnn_rank_forward.1
= control target key start
LH: loop header
LB: loop body
LE: loop exit
PB: predicated region body
PF: predicated region fallthrough
CT: control target
= control target key end

     0   :  { %v2489_v0 = vmov 0   ;;  %s3388_s4 = inlined_call_operand.vmem [shape: f32[128,1], index: 4, kind: input, shape index: {}]   ;;  %s3389_s2 = inlined_call_operand.vmem [shape: f32[128,128], index: 2, kind: input, shape index: {}]   ;;  %s3390_s5 = inlined_call_operand.vmem [shape: f32[128,1], index: 5, kind: input, shape index: {}]   ;;  %s3391_s9 = inlined_call_operand.vmem [shape: f32[128,1], index: 9, kind: input, shape index: {}]   ;;  %s3392_s10 = inlined_call_operand.vmem [shape: f32[128,1], index: 10, kind: input, shape index: {}]   ;;  %s3393_s1 = inlined_call_operand.vmem [shape: f32[128,128], index: 1, kind: input, shape index: {}]   ;;  %s3394_s12 = inlined_call_operand.vmem [shape: s32[128,1], index: 12, kind: input, shape index: {}]   ;;  %s3395_s11 = inlined_call_operand.vmem [shape: s32[128,1], index: 11, kind: input, shape index: {}]   ;;  %s3396_s0 = inlined_call_operand.vmem [shape: f32[128,128], index: 0, kind: input, shape index: {}]   ;;  %s3397_s7 = inlined_call_operand.vmem [shape: f32[128,128], index: 7, kind: input, shape index: {}]   ;;  %s3398_s3 = inlined_call_operand.vmem [shape: f32[1,128], index: 3, kind: input, shape index: {}]   ;;  %s3399_s6 = inlined_call_operand.vmem [shape: f32[128,128], index: 6, kind: input, shape index: {}]   ;;  %s3400_s8 = inlined_call_operand.vmem [shape: f32[1,128], index: 8, kind: input, shape index: {}]   ;;  %s3401_s13 = inlined_call_operand.vmem [shape: f32[1,128], index: 13, kind: output, shape index: {}]  }
   0x1   :  { %2488 = vset.pattern.permute.xlu1 %v2489_v0  ;;  %2487 = vset.pattern.permute.xlu0 %v2489_v0  ;;  %v62_v1 = vld [vmem:[%s3388_s4 + $0x10] sm:$0xff]  ;;  %v60_v2 = vld [vmem:[%s3388_s4] sm:$0xff]  ;;  %v63_v3 = vld [vmem:[%s3388_s4 + $0x18] sm:$0xff] }
   0x2   :  { %88 = vperm.xlu1 %2488, %v62_v1   ;;  %78 = vperm.xlu0 %2487, %v60_v2   ;;  %v61_v4 = vld [vmem:[%s3388_s4 + $0x8] sm:$0xff]  ;;  %v64_v6 = vld [vmem:[%s3388_s4 + $0x20] sm:$0xff]  ;;  %v67_v7 = vld [vmem:[%s3388_s4 + $0x38] sm:$0xff] }
   0x3   :  { %v65_v5 = vld [vmem:[%s3388_s4 + $0x28] sm:$0xff]  ;;  %v66_v8 = vld [vmem:[%s3388_s4 + $0x30] sm:$0xff]  ;;  %v68_v10 = vld [vmem:[%s3388_s4 + $0x40] sm:$0xff] }
   0x4   :  { %v69_v9 = vld [vmem:[%s3388_s4 + $0x48] sm:$0xff]  ;;  %v187_v11 = vld [vmem:[%s3389_s2 + $0x78] sm:$0xff]  ;;  %v186_v12 = vld [vmem:[%s3389_s2 + $0x70] sm:$0xff] }
   0x5   :  { %v71_v13 = vld [vmem:[%s3388_s4 + $0x58] sm:$0xff]  ;;  %v70_v14 = vld [vmem:[%s3388_s4 + $0x50] sm:$0xff]  ;;  %2112 = vmatprep.subr.mxu1 %v187_v11  ;;  %v185_v15 = vld [vmem:[%s3389_s2 + $0x68] sm:$0xff] }
   0x6   :  { %93 = vperm.xlu1 %2488, %v63_v3   ;;  %83 = vperm.xlu0 %2487, %v61_v4   ;;  %v73_v16 = vld [vmem:[%s3388_s4 + $0x68] sm:$0xff]  ;;  %v72_v17 = vld [vmem:[%s3388_s4 + $0x60] sm:$0xff]  ;;  %v183_v19 = vld [vmem:[%s3389_s2 + $0x58] sm:$0xff] }
   0x7   :  { %2113 = vmatpush3.msra.mxu1 %v187_v11  ;;  %v184_v18 = vld [vmem:[%s3389_s2 + $0x60] sm:$0xff]  ;;  %v75_v20 = vld [vmem:[%s3388_s4 + $0x78] sm:$0xff]  ;;  %v74_v21 = vld [vmem:[%s3388_s4 + $0x70] sm:$0xff] }
   0x8   :  { %2114 = vmatprep.subr.mxu1 %v186_v12  ;;  %v182_v22 = vld [vmem:[%s3389_s2 + $0x50] sm:$0xff]  ;;  %v495_v23 = vld [vmem:[%s3390_s5 + $0x8] sm:$0xff]  ;;  %v494_v24 = vld [vmem:[%s3390_s5] sm:$0xff] }
   0x9   :  { %2115 = vmatpush3.msra.mxu1 %v186_v12  ;;  %v181_v25 = vld [vmem:[%s3389_s2 + $0x48] sm:$0xff]  ;;  %v180_v26 = vld [vmem:[%s3389_s2 + $0x40] sm:$0xff]  ;;  %v497_v27 = vld [vmem:[%s3390_s5 + $0x18] sm:$0xff] }
   0xa   :  { %103 = vperm.xlu1 %2488, %v65_v5   ;;  %98 = vperm.xlu0 %2487, %v64_v6   ;;  %v496_v28 = vld [vmem:[%s3390_s5 + $0x10] sm:$0xff]  ;;  %v179_v29 = vld [vmem:[%s3389_s2 + $0x38] sm:$0xff]  ;;  %v646_v30 = vld [vmem:[%s3391_s9 + $0x8] sm:$0xff] }
   0xb   :  { %2116 = vmatprep.subr.mxu1 %v185_v15  ;;  %v645_v31 = vld [vmem:[%s3391_s9] sm:$0xff]  ;;  %v178_v32 = vld [vmem:[%s3389_s2 + $0x30] sm:$0xff]  ;;  %v177_v33 = vld [vmem:[%s3389_s2 + $0x28] sm:$0xff] }
   0xc   :  { %2117 = vmatpush3.msra.mxu1 %v185_v15  ;;  %v499_v34 = vld [vmem:[%s3390_s5 + $0x28] sm:$0xff]  ;;  %v498_v35 = vld [vmem:[%s3390_s5 + $0x20] sm:$0xff]  ;;  %v648_v37 = vld [vmem:[%s3391_s9 + $0x18] sm:$0xff] }
   0xd   :  { %2118 = vmatprep.subr.mxu1 %v184_v18  ;;  %v176_v36 = vld [vmem:[%s3389_s2 + $0x20] sm:$0xff]  ;;  %v647_v38 = vld [vmem:[%s3391_s9 + $0x10] sm:$0xff]  ;;  %v175_v39 = vld [vmem:[%s3389_s2 + $0x18] sm:$0xff] }
   0xe   :  { %113 = vperm.xlu1 %2488, %v67_v7   ;;  %108 = vperm.xlu0 %2487, %v66_v8   ;;  %v174_v40 = vld [vmem:[%s3389_s2 + $0x10] sm:$0xff]  ;;  %v501_v41 = vld [vmem:[%s3390_s5 + $0x38] sm:$0xff]  ;;  %v173_v43 = vld [vmem:[%s3389_s2 + $0x8] sm:$0xff] }
   0xf   :  { %2119 = vmatpush3.msra.mxu1 %v184_v18  ;;  %v500_v42 = vld [vmem:[%s3390_s5 + $0x30] sm:$0xff]  ;;  %v650_v44 = vld [vmem:[%s3391_s9 + $0x28] sm:$0xff]  ;;  %v649_v45 = vld [vmem:[%s3391_s9 + $0x20] sm:$0xff] }
  0x10   :  { %2120 = vmatprep.subr.mxu1 %v183_v19  ;;  %v172_v46 = vld [vmem:[%s3389_s2] sm:$0xff]  ;;  %v503_v47 = vld [vmem:[%s3390_s5 + $0x48] sm:$0xff]  ;;  %v652_v49 = vld [vmem:[%s3391_s9 + $0x38] sm:$0xff] }
  0x11   :  { %2121 = vmatpush3.msra.mxu1 %v183_v19  ;;  %v502_v48 = vld [vmem:[%s3390_s5 + $0x40] sm:$0xff]  ;;  %v651_v50 = vld [vmem:[%s3391_s9 + $0x30] sm:$0xff]  ;;  %v505_v51 = vld [vmem:[%s3390_s5 + $0x58] sm:$0xff] }
  0x12   :  { %123 = vperm.xlu1 %2488, %v69_v9   ;;  %118 = vperm.xlu0 %2487, %v68_v10   ;;  %v504_v52 = vld [vmem:[%s3390_s5 + $0x50] sm:$0xff]  ;;  %v654_v53 = vld [vmem:[%s3391_s9 + $0x48] sm:$0xff]  ;;  %v653_v54 = vld [vmem:[%s3391_s9 + $0x40] sm:$0xff] }
  0x13   :  { %2122 = vmatprep.subr.mxu1 %v182_v22  ;;  %v507_v55 = vld [vmem:[%s3390_s5 + $0x68] sm:$0xff]  ;;  %v506_v56 = vld [vmem:[%s3390_s5 + $0x60] sm:$0xff]  ;;  %v656_v57 = vld [vmem:[%s3391_s9 + $0x58] sm:$0xff] }
  0x14   :  { %2123 = vmatpush3.msra.mxu1 %v182_v22  ;;  %v655_v58 = vld [vmem:[%s3391_s9 + $0x50] sm:$0xff]  ;;  %v509_v59 = vld [vmem:[%s3390_s5 + $0x78] sm:$0xff]  ;;  %v658_v61 = vld [vmem:[%s3391_s9 + $0x68] sm:$0xff] }
  0x15   :  { %2124 = vmatprep.subr.mxu1 %v181_v25  ;;  %v508_v60 = vld [vmem:[%s3390_s5 + $0x70] sm:$0xff]  ;;  %v657_v62 = vld [vmem:[%s3391_s9 + $0x60] sm:$0xff]  ;;  %v660_v63 = vld [vmem:[%s3391_s9 + $0x78] sm:$0xff] }
  0x16   :  { %133 = vperm.xlu1 %2488, %v71_v13   ;;  %128 = vperm.xlu0 %2487, %v70_v14   ;;  %v659_v0 = vld [vmem:[%s3391_s9 + $0x70] sm:$0xff]  ;;  %v1094_v2 = vld [vmem:[%s3392_s10 + $0x78] sm:$0xff]  ;;  %v1091_v3 = vld [vmem:[%s3392_s10 + $0x60] sm:$0xff] }
  0x17   :  { %2125 = vmatpush3.msra.mxu1 %v181_v25  ;;  %v1093_v1 = vld [vmem:[%s3392_s10 + $0x70] sm:$0xff]  ;;  %v1092_v4 = vld [vmem:[%s3392_s10 + $0x68] sm:$0xff]  ;;  %v1090_v6 = vld [vmem:[%s3392_s10 + $0x58] sm:$0xff] }
  0x18   :  { %2126 = vmatprep.subr.mxu1 %v180_v26  ;;  %v1089_v5 = vld [vmem:[%s3392_s10 + $0x50] sm:$0xff]  ;;  %v1087_v7 = vld [vmem:[%s3392_s10 + $0x40] sm:$0xff]  ;;  %v1088_v8 = vld [vmem:[%s3392_s10 + $0x48] sm:$0xff] }
  0x19   :  { %2127 = vmatpush3.msra.mxu1 %v180_v26  ;;  %v1085_v9 = vld [vmem:[%s3392_s10 + $0x30] sm:$0xff]  ;;  %v1086_v10 = vld [vmem:[%s3392_s10 + $0x38] sm:$0xff]  ;;  %v1083_v11 = vld [vmem:[%s3392_s10 + $0x20] sm:$0xff] }
  0x1a   :  { %143 = vperm.xlu1 %2488, %v73_v16   ;;  %138 = vperm.xlu0 %2487, %v72_v17   ;;  %v1084_v12 = vld [vmem:[%s3392_s10 + $0x28] sm:$0xff]  ;;  %v1081_v13 = vld [vmem:[%s3392_s10 + $0x10] sm:$0xff]  ;;  %v1082_v14 = vld [vmem:[%s3392_s10 + $0x18] sm:$0xff] }
  0x1b   :  { %2128 = vmatprep.subr.mxu1 %v179_v29  ;;  %v1079_v15 = vld [vmem:[%s3392_s10] sm:$0xff]  ;;  %v1080_v16 = vld [vmem:[%s3392_s10 + $0x8] sm:$0xff] }
  0x1c   :  { %2129 = vmatpush3.msra.mxu1 %v179_v29  ;;  %v44_v17 = vld [vmem:[%s3393_s1] sm:$0xff]  ;;  %v45_v22 = vld [vmem:[%s3393_s1 + $0x8] sm:$0xff] }
  0x1d   :  { %2130 = vmatprep.subr.mxu1 %v178_v32 }
  0x1e   :  { %153 = vperm.xlu1 %2488, %v75_v20   ;;  %148 = vperm.xlu0 %2487, %v74_v21   ;;  %v46_v20 = vld [vmem:[%s3393_s1 + $0x10] sm:$0xff] }
  0x1f   :  { %2131 = vmatpush3.msra.mxu1 %v178_v32  ;;  %v1233_v32 = vld [vmem:[%s3395_s11 + $0x8] sm:$0xff] }
  0x20   :  { %2132 = vmatprep.subr.mxu1 %v177_v33 }
  0x21   :  { %2133 = vmatpush3.msra.mxu1 %v177_v33 }
  0x22   :  { %517 = vperm.xlu1 %2488, %v495_v23   ;;  %512 = vperm.xlu0 %2487, %v494_v24   ;;  %v1344_v23 = vld [vmem:[%s3394_s12] sm:$0xff] }
  0x23   :  { %2134 = vmatprep.subr.mxu1 %v176_v36  ;;  %v1232_v24 = vld [vmem:[%s3395_s11] sm:$0xff] }
  0x24   :  { %2135 = vmatpush3.msra.mxu1 %v176_v36  ;;  %v49_v36 = vld [vmem:[%s3393_s1 + $0x28] sm:$0xff] }
  0x25   :  { %2136 = vmatprep.subr.mxu1 %v175_v39 }
  0x26   :  { %527 = vperm.xlu1 %2488, %v497_v27   ;;  %522 = vperm.xlu0 %2487, %v496_v28   ;;  %v47_v28 = vld [vmem:[%s3393_s1 + $0x18] sm:$0xff] }
  0x27   :  { %2137 = vmatpush3.msra.mxu1 %v175_v39  ;;  %v1346_v39 = vld [vmem:[%s3394_s12 + $0x10] sm:$0xff] }
  0x28   :  { %2138 = vmatprep.subr.mxu1 %v174_v40 }
  0x29   :  { %2139 = vmatpush3.msra.mxu1 %v174_v40  ;;  %v1234_v40 = vld [vmem:[%s3395_s11 + $0x10] sm:$0xff] }
  0x2a   :  { %668 = vperm.xlu1 %2488, %v646_v30   ;;  %663 = vperm.xlu0 %2487, %v645_v31   ;;  %v48_v30 = vld [vmem:[%s3393_s1 + $0x20] sm:$0xff]  ;;  %v1345_v31 = vld [vmem:[%s3394_s12 + $0x8] sm:$0xff] }
  0x2b   :  { %2140 = vmatprep.subr.mxu1 %v173_v43 }
  0x2c   :  { %2141 = vmatpush3.msra.mxu1 %v173_v43 }
  0x2d   :  { %2142 = vmatprep.subr.mxu1 %v172_v46 }
  0x2e   :  { %537 = vperm.xlu1 %2488, %v499_v34   ;;  %532 = vperm.xlu0 %2487, %v498_v35  }
  0x2f   :  { %2143 = vmatpush3.msra.mxu1 %v172_v46  ;;  %v52_v46 = vld [vmem:[%s3393_s1 + $0x40] sm:$0xff] }
  0x32   :  { %678 = vperm.xlu1 %2488, %v648_v37   ;;  %673 = vperm.xlu0 %2487, %v647_v38   ;;  %v50_v38 = vld [vmem:[%s3393_s1 + $0x30] sm:$0xff] }
  0x36   :  { %547 = vperm.xlu1 %2488, %v501_v41   ;;  %542 = vperm.xlu0 %2487, %v500_v42  }
  0x3a   :  { %688 = vperm.xlu1 %2488, %v650_v44   ;;  %683 = vperm.xlu0 %2487, %v649_v45   ;;  %v51_v44 = vld [vmem:[%s3393_s1 + $0x38] sm:$0xff] }
  0x3e   :  { %557 = vperm.xlu1 %2488, %v503_v47   ;;  %552 = vperm.xlu0 %2487, %v502_v48   ;;  %v1347_v47 = vld [vmem:[%s3394_s12 + $0x18] sm:$0xff] }
  0x3f   :  { %v1235_v48 = vld [vmem:[%s3395_s11 + $0x18] sm:$0xff] }
  0x42   :  { %698 = vperm.xlu1 %2488, %v652_v49   ;;  %693 = vperm.xlu0 %2487, %v651_v50  }
  0x46   :  { %567 = vperm.xlu1 %2488, %v505_v51   ;;  %562 = vperm.xlu0 %2487, %v504_v52   ;;  %v53_v52 = vld [vmem:[%s3393_s1 + $0x48] sm:$0xff] }
  0x4a   :  { %708 = vperm.xlu1 %2488, %v654_v53   ;;  %703 = vperm.xlu0 %2487, %v653_v54   ;;  %v54_v54 = vld [vmem:[%s3393_s1 + $0x50] sm:$0xff] }
  0x4e   :  { %577 = vperm.xlu1 %2488, %v507_v55   ;;  %572 = vperm.xlu0 %2487, %v506_v56   ;;  %v1348_v55 = vld [vmem:[%s3394_s12 + $0x20] sm:$0xff] }
  0x4f   :  { %v1236_v56 = vld [vmem:[%s3395_s11 + $0x20] sm:$0xff] }
  0x52   :  { %718 = vperm.xlu1 %2488, %v656_v57   ;;  %713 = vperm.xlu0 %2487, %v655_v58  }
  0x56   :  { %587 = vperm.xlu1 %2488, %v509_v59   ;;  %582 = vperm.xlu0 %2487, %v508_v60   ;;  %v55_v60 = vld [vmem:[%s3393_s1 + $0x58] sm:$0xff] }
  0x5a   :  { %728 = vperm.xlu1 %2488, %v658_v61   ;;  %723 = vperm.xlu0 %2487, %v657_v62   ;;  %v56_v62 = vld [vmem:[%s3393_s1 + $0x60] sm:$0xff] }
  0x5e   :  { %738 = vperm.xlu1 %2488, %v660_v63   ;;  %733 = vperm.xlu0 %2487, %v659_v0   ;;  %v1349_v63 = vld [vmem:[%s3394_s12 + $0x28] sm:$0xff] }
  0x5f   :  { %v1237_v0 = vld [vmem:[%s3395_s11 + $0x28] sm:$0xff] }
  0x62   :  { %1167 = vperm.xlu1 %2488, %v1093_v1   ;;  %1172 = vperm.xlu0 %2487, %v1094_v2  }
  0x66   :  { %1157 = vperm.xlu1 %2488, %v1091_v3   ;;  %1162 = vperm.xlu0 %2487, %v1092_v4   ;;  %v57_v4 = vld [vmem:[%s3393_s1 + $0x68] sm:$0xff] }
  0x6a   :  { %1147 = vperm.xlu1 %2488, %v1089_v5   ;;  %1152 = vperm.xlu0 %2487, %v1090_v6   ;;  %v58_v6 = vld [vmem:[%s3393_s1 + $0x70] sm:$0xff] }
  0x6e   :  { %1137 = vperm.xlu1 %2488, %v1087_v7   ;;  %1142 = vperm.xlu0 %2487, %v1088_v8   ;;  %v1350_v7 = vld [vmem:[%s3394_s12 + $0x30] sm:$0xff] }
  0x6f   :  { %v1238_v8 = vld [vmem:[%s3395_s11 + $0x30] sm:$0xff] }
  0x72   :  { %1127 = vperm.xlu1 %2488, %v1085_v9   ;;  %1132 = vperm.xlu0 %2487, %v1086_v10  }
  0x76   :  { %1117 = vperm.xlu1 %2488, %v1083_v11   ;;  %1122 = vperm.xlu0 %2487, %v1084_v12  }
  0x7a   :  { %1107 = vperm.xlu1 %2488, %v1081_v13   ;;  %1112 = vperm.xlu0 %2487, %v1082_v14   ;;  %v59_v13 = vld [vmem:[%s3393_s1 + $0x78] sm:$0xff] }
  0x7b   :  { %v1351_v14 = vld [vmem:[%s3394_s12 + $0x38] sm:$0xff] }
  0x7d   :  { %v89_v18 = vpop.permute.xlu1 %88  ;;  %v79_v19 = vpop.permute.xlu0 %78 }
  0x7e   :  { %1097 = vperm.xlu1 %2488, %v1079_v15   ;;  %1102 = vperm.xlu0 %2487, %v1080_v16   ;;  %v156_v21 = vmul.f32 %v79_v19, %v44_v17  ;;  %v158_v25 = vmul.f32 %v89_v18, %v46_v20  ;;  %v1239_v15 = vld [vmem:[%s3395_s11 + $0x38] sm:$0xff]  ;;  %v1352_v17 = vld [vmem:[%s3394_s12 + $0x40] sm:$0xff]  ;;  %v1353_v19 = vld [vmem:[%s3394_s12 + $0x48] sm:$0xff] }
  0x7f   :  { %v1240_v18 = vld [vmem:[%s3395_s11 + $0x40] sm:$0xff]  ;;  %v1241_v20 = vld [vmem:[%s3395_s11 + $0x48] sm:$0xff] }
  0x80   :  { %2144 = vmatprep.mubr.f32.mxu1 %v156_v21  ;;  %v1354_v21 = vld [vmem:[%s3394_s12 + $0x50] sm:$0xff] }
  0x81   :  { %v94_v26 = vpop.permute.xlu1 %93  ;;  %v84_v27 = vpop.permute.xlu0 %83 }
  0x82   :  { %v157_v29 = vmul.f32 %v84_v27, %v45_v22  ;;  %1361 = vperm.xlu1 %2488, %v1344_v23   ;;  %1249 = vperm.xlu0 %2487, %v1232_v24   ;;  %v159_v35 = vmul.f32 %v94_v26, %v47_v28  ;;  %v1242_v22 = vld [vmem:[%s3395_s11 + $0x50] sm:$0xff]  ;;  %v1355_v23 = vld [vmem:[%s3394_s12 + $0x58] sm:$0xff]  ;;  %v1244_v26 = vld [vmem:[%s3395_s11 + $0x60] sm:$0xff] }
  0x83   :  { %v1243_v24 = vld [vmem:[%s3395_s11 + $0x58] sm:$0xff]  ;;  %v1357_v27 = vld [vmem:[%s3394_s12 + $0x68] sm:$0xff] }
  0x84   :  { %2145 = vmatmul.mubr.f32.vlgmr.msra.gmra.mxu1 %v157_v29  ;;  %v1245_v28 = vld [vmem:[%s3395_s11 + $0x68] sm:$0xff]  ;;  %v1358_v29 = vld [vmem:[%s3394_s12 + $0x70] sm:$0xff] }
  0x85   :  { %v104_v33 = vpop.permute.xlu1 %103  ;;  %v99_v34 = vpop.permute.xlu0 %98  ;;  %2147 = vmatprep.mubr.f32.mxu1 %v158_v25  ;;  %v1356_v25 = vld [vmem:[%s3394_s12 + $0x60] sm:$0xff] }
  0x86   :  { %v160_v37 = vmul.f32 %v99_v34, %v48_v30  ;;  %1364 = vperm.xlu1 %2488, %v1345_v31   ;;  %1252 = vperm.xlu0 %2487, %v1233_v32   ;;  %v161_v43 = vmul.f32 %v104_v33, %v49_v36  ;;  %v1246_v30 = vld [vmem:[%s3395_s11 + $0x70] sm:$0xff]  ;;  %v1359_v31 = vld [vmem:[%s3394_s12 + $0x78] sm:$0xff]  ;;  %v333_v33 = vld [vmem:[%s3396_s0] sm:$0xff] }
  0x87   :  { %v1247_v32 = vld [vmem:[%s3395_s11 + $0x78] sm:$0xff]  ;;  %v770_v36 = vld [vmem:[%s3397_s7 + $0x68] sm:$0xff] }
  0x88   :  { %2148 = vmatmul.mubr.f32.gmra.mxu1 %v159_v35  ;;  %v772_v34 = vld [vmem:[%s3397_s7 + $0x78] sm:$0xff]  ;;  %v771_v35 = vld [vmem:[%s3397_s7 + $0x70] sm:$0xff] }
  0x89   :  { %v114_v41 = vpop.permute.xlu1 %113  ;;  %v109_v42 = vpop.permute.xlu0 %108  ;;  %2150 = vmatprep.mubr.f32.mxu1 %v160_v37  ;;  %2224 = vmatprep.subr.mxu0 %v772_v34  ;;  %v769_v37 = vld [vmem:[%s3397_s7 + $0x60] sm:$0xff] }
  0x8a   :  { %v162_v45 = vmul.f32 %v109_v42, %v50_v38  ;;  %1367 = vperm.xlu1 %2488, %v1346_v39   ;;  %1255 = vperm.xlu0 %2487, %v1234_v40   ;;  %v163_v51 = vmul.f32 %v114_v41, %v51_v44  ;;  %v768_v38 = vld [vmem:[%s3397_s7 + $0x58] sm:$0xff]  ;;  %v767_v39 = vld [vmem:[%s3397_s7 + $0x50] sm:$0xff]  ;;  %v766_v40 = vld [vmem:[%s3397_s7 + $0x48] sm:$0xff] }
  0x8b   :  { %2225 = vmatpush3.msra.mxu0 %v772_v34  ;;  %v765_v41 = vld [vmem:[%s3397_s7 + $0x40] sm:$0xff]  ;;  %v764_v42 = vld [vmem:[%s3397_s7 + $0x38] sm:$0xff] }
  0x8c   :  { %2151 = vmatmul.mubr.f32.gmra.mxu1 %v161_v43  ;;  %2226 = vmatprep.subr.mxu0 %v771_v35  ;;  %v763_v43 = vld [vmem:[%s3397_s7 + $0x30] sm:$0xff] }
  0x8d   :  { %v124_v49 = vpop.permute.xlu1 %123  ;;  %v119_v50 = vpop.permute.xlu0 %118  ;;  %2153 = vmatprep.mubr.f32.mxu1 %v162_v45  ;;  %2227 = vmatpush3.msra.mxu0 %v771_v35 }
  0x8e   :  { %v164_v53 = vmul.f32 %v119_v50, %v52_v46  ;;  %1370 = vperm.xlu1 %2488, %v1347_v47   ;;  %1258 = vperm.xlu0 %2487, %v1235_v48   ;;  %v165_v59 = vmul.f32 %v124_v49, %v53_v52 }
  0x8f   :  { %2228 = vmatprep.subr.mxu0 %v770_v36 }
  0x90   :  { %2154 = vmatmul.mubr.f32.gmra.mxu1 %v163_v51  ;;  %2229 = vmatpush3.msra.mxu0 %v770_v36 }
  0x91   :  { %v134_v57 = vpop.permute.xlu1 %133  ;;  %v129_v58 = vpop.permute.xlu0 %128  ;;  %2156 = vmatprep.mubr.f32.mxu1 %v164_v53  ;;  %2230 = vmatprep.subr.mxu0 %v769_v37 }
  0x92   :  { %v166_v61 = vmul.f32 %v129_v58, %v54_v54  ;;  %1373 = vperm.xlu1 %2488, %v1348_v55   ;;  %1261 = vperm.xlu0 %2487, %v1236_v56   ;;  %v167_v3 = vmul.f32 %v134_v57, %v55_v60  ;;  %v334_v60 = vld [vmem:[%s3396_s0 + $0x8] sm:$0xff] }
  0x93   :  { %2231 = vmatpush3.msra.mxu0 %v769_v37 }
  0x94   :  { %2157 = vmatmul.mubr.f32.gmra.mxu1 %v165_v59  ;;  %2232 = vmatprep.subr.mxu0 %v768_v38 }
  0x95   :  { %v144_v1 = vpop.permute.xlu1 %143  ;;  %v139_v2 = vpop.permute.xlu0 %138  ;;  %2159 = vmatprep.mubr.f32.mxu1 %v166_v61  ;;  %2233 = vmatpush3.msra.mxu0 %v768_v38  ;;  %v335_v61 = vld [vmem:[%s3396_s0 + $0x10] sm:$0xff] }
  0x96   :  { %v168_v5 = vmul.f32 %v139_v2, %v56_v62  ;;  %1376 = vperm.xlu1 %2488, %v1349_v63   ;;  %1264 = vperm.xlu0 %2487, %v1237_v0   ;;  %v169_v10 = vmul.f32 %v144_v1, %v57_v4  ;;  %v336_v62 = vld [vmem:[%s3396_s0 + $0x18] sm:$0xff]  ;;  %v337_v63 = vld [vmem:[%s3396_s0 + $0x20] sm:$0xff]  ;;  %v338_v0 = vld [vmem:[%s3396_s0 + $0x28] sm:$0xff] }
  0x97   :  { %2234 = vmatprep.subr.mxu0 %v767_v39  ;;  %v339_v1 = vld [vmem:[%s3396_s0 + $0x30] sm:$0xff]  ;;  %v340_v2 = vld [vmem:[%s3396_s0 + $0x38] sm:$0xff]  ;;  %v342_v4 = vld [vmem:[%s3396_s0 + $0x48] sm:$0xff] }
  0x98   :  { %2160 = vmatmul.mubr.f32.gmra.mxu1 %v167_v3  ;;  %2235 = vmatpush3.msra.mxu0 %v767_v39  ;;  %v341_v3 = vld [vmem:[%s3396_s0 + $0x40] sm:$0xff] }
  0x99   :  { %v149_v9 = vpop.permute.xlu0 %148  ;;  %2162 = vmatprep.mubr.f32.mxu1 %v168_v5  ;;  %v154_v12 = vpop.permute.xlu1 %153  ;;  %2236 = vmatprep.subr.mxu0 %v766_v40  ;;  %v343_v5 = vld [vmem:[%s3396_s0 + $0x50] sm:$0xff] }
  0x9a   :  { %v170_v11 = vmul.f32 %v149_v9, %v58_v6  ;;  %1379 = vperm.xlu1 %2488, %v1350_v7   ;;  %1267 = vperm.xlu0 %2487, %v1238_v8   ;;  %v171_v16 = vmul.f32 %v154_v12, %v59_v13  ;;  %v344_v6 = vld [vmem:[%s3396_s0 + $0x58] sm:$0xff]  ;;  %v345_v7 = vld [vmem:[%s3396_s0 + $0x60] sm:$0xff]  ;;  %v346_v8 = vld [vmem:[%s3396_s0 + $0x68] sm:$0xff] }
  0x9b   :  { %2237 = vmatpush3.msra.mxu0 %v766_v40  ;;  %v347_v9 = vld [vmem:[%s3396_s0 + $0x70] sm:$0xff]  ;;  %v761_v12 = vld [vmem:[%s3397_s7 + $0x20] sm:$0xff]  ;;  %v760_v13 = vld [vmem:[%s3397_s7 + $0x18] sm:$0xff] }
  0x9c   :  { %2163 = vmatmul.mubr.f32.gmra.mxu1 %v169_v10  ;;  %2238 = vmatprep.subr.mxu0 %v765_v41  ;;  %v348_v10 = vld [vmem:[%s3396_s0 + $0x78] sm:$0xff] }
  0x9d   :  { %2165 = vmatprep.mubr.f32.mxu1 %v170_v11  ;;  %2239 = vmatpush3.msra.mxu0 %v765_v41  ;;  %v762_v11 = vld [vmem:[%s3397_s7 + $0x28] sm:$0xff] }
  0x9e   :  { %1382 = vperm.xlu1 %2488, %v1351_v14   ;;  %1270 = vperm.xlu0 %2487, %v1239_v15   ;;  %v759_v14 = vld [vmem:[%s3397_s7 + $0x10] sm:$0xff]  ;;  %v758_v15 = vld [vmem:[%s3397_s7 + $0x8] sm:$0xff] }
  0x9f   :  { %2240 = vmatprep.subr.mxu0 %v764_v42 }
  0xa0   :  { %2166 = vmatmul.mubr.f32.gmra.mxu1 %v171_v16  ;;  %2241 = vmatpush3.msra.mxu0 %v764_v42  ;;  %v757_v16 = vld [vmem:[%s3397_s7] sm:$0xff] }
  0xa1   :  { %2200 = vmatprep.mubr.f32.mxu1 %v333_v33  ;;  %2242 = vmatprep.subr.mxu0 %v763_v43 }
  0xa2   :  { %1385 = vperm.xlu1 %2488, %v1352_v17   ;;  %1273 = vperm.xlu0 %2487, %v1240_v18   ;;  %v513_v17 = vpop.permute.xlu0 %512 }
  0xa3   :  { %2243 = vmatpush3.msra.mxu0 %v763_v43 }
  0xa4   :  { %2244 = vmatprep.subr.mxu0 %v762_v11 }
  0xa5   :  { %2245 = vmatpush3.msra.mxu0 %v762_v11 }
  0xa6   :  { %1388 = vperm.xlu1 %2488, %v1353_v19   ;;  %1276 = vperm.xlu0 %2487, %v1241_v20   ;;  %v523_v18 = vpop.permute.xlu0 %522 }
  0xa7   :  { %2246 = vmatprep.subr.mxu0 %v761_v12 }
  0xa8   :  { %2247 = vmatpush3.msra.mxu0 %v761_v12 }
  0xa9   :  { %2248 = vmatprep.subr.mxu0 %v760_v13 }
  0xaa   :  { %1391 = vperm.xlu1 %2488, %v1354_v21   ;;  %1279 = vperm.xlu0 %2487, %v1242_v22   ;;  %v664_v19 = vpop.permute.xlu0 %663 }
  0xab   :  { %2249 = vmatpush3.msra.mxu0 %v760_v13 }
  0xac   :  { %2250 = vmatprep.subr.mxu0 %v759_v14 }
  0xad   :  { %2251 = vmatpush3.msra.mxu0 %v759_v14 }
  0xae   :  { %1394 = vperm.xlu1 %2488, %v1355_v23   ;;  %1282 = vperm.xlu0 %2487, %v1243_v24   ;;  %v533_v20 = vpop.permute.xlu0 %532 }
  0xaf   :  { %2252 = vmatprep.subr.mxu0 %v758_v15 }
  0xb0   :  { %2253 = vmatpush3.msra.mxu0 %v758_v15 }
  0xb1   :  { %2254 = vmatprep.subr.mxu0 %v757_v16 }
  0xb2   :  { %1397 = vperm.xlu1 %2488, %v1356_v25   ;;  %1285 = vperm.xlu0 %2487, %v1244_v26   ;;  %v674_v21 = vpop.permute.xlu0 %673  ;;  %v518_v26 = vpop.permute.xlu1 %517 }
  0xb3   :  { %2255 = vmatpush3.msra.mxu0 %v757_v16 }
  0xb6   :  { %1400 = vperm.xlu1 %2488, %v1357_v27   ;;  %1288 = vperm.xlu0 %2487, %v1245_v28   ;;  %v3043_v22 = vpop.permute.xlu0 %542  ;;  %v528_v28 = vpop.permute.xlu1 %527 }
  0xba   :  { %1403 = vperm.xlu1 %2488, %v1358_v29   ;;  %1291 = vperm.xlu0 %2487, %v1246_v30   ;;  %v3045_v23 = vpop.permute.xlu0 %683  ;;  %v669_v30 = vpop.permute.xlu1 %668 }
  0xbe   :  { %1406 = vperm.xlu1 %2488, %v1359_v31   ;;  %1294 = vperm.xlu0 %2487, %v1247_v32   ;;  %v3047_v24 = vpop.permute.xlu0 %552  ;;  %v538_v32 = vpop.permute.xlu1 %537 }
  0xc2   :  { %v3049_v25 = vpop.permute.xlu0 %693  ;;  %v679_v34 = vpop.permute.xlu1 %678 }
  0xc6   :  { %v3051_v27 = vpop.permute.xlu0 %562  ;;  %v548_v36 = vpop.permute.xlu1 %547 }
  0xca   :  { %v3053_v29 = vpop.permute.xlu0 %703  ;;  %v689_v38 = vpop.permute.xlu1 %688 }
  0xce   :  { %v3055_v31 = vpop.permute.xlu0 %572  ;;  %v558_v40 = vpop.permute.xlu1 %557 }
  0xd2   :  { %v3057_v33 = vpop.permute.xlu0 %713  ;;  %v3067_v42 = vpop.permute.xlu1 %698 }
  0xd6   :  { %v3059_v35 = vpop.permute.xlu0 %582 }
  0xda   :  { %v3061_v37 = vpop.permute.xlu0 %723 }
  0xde   :  { %v3063_v39 = vpop.permute.xlu0 %733 }
  0xe2   :  { %v3065_v41 = vpop.permute.xlu0 %1172 }
  0xe6   :  { %v3069_v43 = vpop.permute.xlu0 %1162 }
 0x144   :  { %v2146_v44 = vpop.f32.mrf.mxu1 }
 0x146   :  { %v254_v45 = vpop.f32.mrf.mxu1 }
 0x148   :  { %v2149_v46 = vpop.f32.mrf.mxu1 }
 0x14a   :  { %v264_v47 = vpop.f32.mrf.mxu1 }
 0x14c   :  { %v2152_v48 = vpop.f32.mrf.mxu1 }
 0x14e   :  { %v274_v49 = vpop.f32.mrf.mxu1 }
 0x150   :  { %v2155_v50 = vpop.f32.mrf.mxu1 }
 0x152   :  { %v284_v51 = vpop.f32.mrf.mxu1 }
 0x154   :  { %v2158_v52 = vpop.f32.mrf.mxu1 }
 0x156   :  { %v294_v53 = vpop.f32.mrf.mxu1 }
 0x158   :  { %v2161_v54 = vpop.f32.mrf.mxu1 }
 0x15a   :  { %v304_v55 = vpop.f32.mrf.mxu1 }
 0x15c   :  { %v2164_v56 = vpop.f32.mrf.mxu1 }
 0x15e   :  { %v314_v57 = vpop.f32.mrf.mxu1 }
 0x160   :  { %v2167_v58 = vpop.f32.mrf.mxu1 }
 0x161   :  { %2168 = vmatprep.subr.mxu1 %v2167_v58 }
 0x162   :  { %v324_v59 = vpop.f32.mrf.mxu1  ;;  %2169 = vmatpush3.msra.mxu1 %v2167_v58 }
 0x163   :  { %2170 = vmatprep.subr.mxu1 %v324_v59 }
 0x164   :  { %2171 = vmatpush3.msra.mxu1 %v324_v59 }
 0x165   :  { %2172 = vmatprep.subr.mxu1 %v2164_v56 }
 0x166   :  { %2173 = vmatpush3.msra.mxu1 %v2164_v56 }
 0x167   :  { %2174 = vmatprep.subr.mxu1 %v314_v57 }
 0x168   :  { %2175 = vmatpush3.msra.mxu1 %v314_v57 }
 0x169   :  { %2176 = vmatprep.subr.mxu1 %v2161_v54 }
 0x16a   :  { %2177 = vmatpush3.msra.mxu1 %v2161_v54 }
 0x16b   :  { %2178 = vmatprep.subr.mxu1 %v304_v55 }
 0x16c   :  { %2179 = vmatpush3.msra.mxu1 %v304_v55 }
 0x16d   :  { %2180 = vmatprep.subr.mxu1 %v2158_v52 }
 0x16e   :  { %2181 = vmatpush3.msra.mxu1 %v2158_v52 }
 0x16f   :  { %2182 = vmatprep.subr.mxu1 %v294_v53 }
 0x170   :  { %2183 = vmatpush3.msra.mxu1 %v294_v53 }
 0x171   :  { %2184 = vmatprep.subr.mxu1 %v2155_v50 }
 0x172   :  { %2185 = vmatpush3.msra.mxu1 %v2155_v50 }
 0x173   :  { %2186 = vmatprep.subr.mxu1 %v284_v51 }
 0x174   :  { %2187 = vmatpush3.msra.mxu1 %v284_v51 }
 0x175   :  { %2188 = vmatprep.subr.mxu1 %v2152_v48 }
 0x176   :  { %2189 = vmatpush3.msra.mxu1 %v2152_v48 }
 0x177   :  { %2190 = vmatprep.subr.mxu1 %v274_v49 }
 0x178   :  { %2191 = vmatpush3.msra.mxu1 %v274_v49 }
 0x179   :  { %2192 = vmatprep.subr.mxu1 %v2149_v46 }
 0x17a   :  { %2193 = vmatpush3.msra.mxu1 %v2149_v46  ;;  %v568_v46 = vpop.permute.xlu1 %567 }
 0x17b   :  { %2194 = vmatprep.subr.mxu1 %v264_v47 }
 0x17c   :  { %2195 = vmatpush3.msra.mxu1 %v264_v47  ;;  %v3076_v47 = vpop.permute.xlu0 %1152 }
 0x17d   :  { %2196 = vmatprep.subr.mxu1 %v2146_v44 }
 0x17e   :  { %2197 = vmatpush3.msra.mxu1 %v2146_v44  ;;  %v3080_v57 = vpop.permute.xlu1 %708 }
 0x17f   :  { %2198 = vmatprep.subr.mxu1 %v254_v45 }
 0x180   :  { %2199 = vmatpush3.msra.mxu1 %v254_v45  ;;  %v3074_v45 = vld [vmem:[%s3398_s3] ss:$0 sm:$0xff]  ;;  %v3082_v58 = vpop.permute.xlu0 %1142 }
 0x181   :  { %2201 = vmatmul.mubr.f32.vlgmr.msra.gmra.mxu1 %v334_v60 }
 0x182   :  { %2203 = vmatprep.mubr.f32.mxu1 %v335_v61 }
 0x185   :  { %2204 = vmatmul.mubr.f32.gmra.mxu1 %v336_v62 }
 0x186   :  { %2206 = vmatprep.mubr.f32.mxu1 %v337_v63 }
 0x189   :  { %2207 = vmatmul.mubr.f32.gmra.mxu1 %v338_v0 }
 0x18a   :  { %2209 = vmatprep.mubr.f32.mxu1 %v339_v1 }
 0x18d   :  { %2210 = vmatmul.mubr.f32.gmra.mxu1 %v340_v2 }
 0x18e   :  { %2212 = vmatprep.mubr.f32.mxu1 %v341_v3 }
 0x191   :  { %2213 = vmatmul.mubr.f32.gmra.mxu1 %v342_v4 }
 0x192   :  { %2215 = vmatprep.mubr.f32.mxu1 %v343_v5 }
 0x195   :  { %2216 = vmatmul.mubr.f32.gmra.mxu1 %v344_v6 }
 0x196   :  { %2218 = vmatprep.mubr.f32.mxu1 %v345_v7 }
 0x199   :  { %2219 = vmatmul.mubr.f32.gmra.mxu1 %v346_v8 }
 0x19a   :  { %2221 = vmatprep.mubr.f32.mxu1 %v347_v9  ;;  %v578_v9 = vpop.permute.xlu1 %577 }
 0x19d   :  { %2222 = vmatmul.mubr.f32.gmra.mxu1 %v348_v10  ;;  %v3087_v10 = vpop.permute.xlu0 %1132 }
 0x241   :  { %v2202_v44 = vpop.f32.mrf.mxu1 }
 0x242   :  { %v591_v48 = vmul.f32 %v2202_v44, %v518_v26 }
 0x243   :  { %v415_v49 = vpop.f32.mrf.mxu1 }
 0x244   :  { %v614_v50 = vadd.f32 %v3074_v45, %v591_v48  ;;  %v590_v51 = vmul.f32 %v513_v17, %v415_v49  ;;  %v3094_v48 = vpop.permute.xlu0 %1122 }
 0x245   :  { %v2205_v52 = vpop.f32.mrf.mxu1 }
 0x246   :  { %v593_v53 = vmul.f32 %v2205_v52, %v528_v28  ;;  %v613_v54 = vadd.f32 %v3074_v45, %v590_v51  ;;  %v630_v55 = vmax.f32 %v614_v50, 0.0 }
 0x247   :  { %v425_v56 = vpop.f32.mrf.mxu1 }
 0x248   :  { %v616_v59 = vadd.f32 %v3074_v45, %v593_v53  ;;  %v592_v60 = vmul.f32 %v523_v18, %v425_v56  ;;  %v629_v61 = vmax.f32 %v613_v54, 0.0  ;;  %v742_v4 = vmul.f32 %v669_v30, %v630_v55 }
 0x249   :  { %v2208_v62 = vpop.f32.mrf.mxu1 }
 0x24a   :  { %v615_v63 = vadd.f32 %v3074_v45, %v592_v60  ;;  %v595_v0 = vmul.f32 %v2208_v62, %v538_v32  ;;  %v741_v1 = vmul.f32 %v664_v19, %v629_v61  ;;  %v632_v2 = vmax.f32 %v616_v59, 0.0  ;;  %v3103_v60 = vpop.permute.xlu0 %1112 }
 0x24b   :  { %v435_v3 = vpop.f32.mrf.mxu1 }
 0x24c   :  { %v631_v5 = vmax.f32 %v615_v63, 0.0  ;;  %v618_v6 = vadd.f32 %v3074_v45, %v595_v0  ;;  %v594_v7 = vmul.f32 %v533_v20, %v435_v3  ;;  %2256 = vmatprep.mubr.f32.mxu0 %v741_v1  ;;  %v744_v16 = vmul.f32 %v679_v34, %v632_v2 }
 0x24d   :  { %v2211_v8 = vpop.f32.mrf.mxu1  ;;  %2257 = vmatmul.mubr.f32.vlgmr.msra.gmra.mxu0 %v742_v4 }
 0x24e   :  { %v617_v11 = vadd.f32 %v3074_v45, %v594_v7  ;;  %v597_v12 = vmul.f32 %v2211_v8, %v548_v36  ;;  %v743_v13 = vmul.f32 %v674_v21, %v631_v5  ;;  %v634_v14 = vmax.f32 %v618_v6, 0.0  ;;  %v719_v21 = vpop.permute.xlu1 %718 }
 0x24f   :  { %v445_v15 = vpop.f32.mrf.mxu1 }
 0x250   :  { %v633_v17 = vmax.f32 %v617_v11, 0.0  ;;  %v620_v18 = vadd.f32 %v3074_v45, %v597_v12  ;;  %v596_v19 = vmul.f32 %v3043_v22, %v445_v15  ;;  %2259 = vmatprep.mubr.f32.mxu0 %v743_v13  ;;  %v746_v36 = vmul.f32 %v689_v38, %v634_v14 }
 0x251   :  { %v2214_v20 = vpop.f32.mrf.mxu1  ;;  %2260 = vmatmul.mubr.f32.gmra.mxu0 %v744_v16 }
 0x252   :  { %v619_v26 = vadd.f32 %v3074_v45, %v596_v19  ;;  %v599_v28 = vmul.f32 %v2214_v20, %v558_v40  ;;  %v745_v30 = vmul.f32 %v3045_v23, %v633_v17  ;;  %v636_v32 = vmax.f32 %v620_v18, 0.0 }
 0x253   :  { %v455_v44 = vpop.f32.mrf.mxu1 }
 0x254   :  { %v635_v34 = vmax.f32 %v619_v26, 0.0  ;;  %v622_v49 = vadd.f32 %v3074_v45, %v599_v28  ;;  %v598_v50 = vmul.f32 %v3047_v24, %v455_v44  ;;  %2262 = vmatprep.mubr.f32.mxu0 %v745_v30  ;;  %v748_v38 = vmul.f32 %v3067_v42, %v636_v32  ;;  %v588_v24 = vpop.permute.xlu1 %587 }
 0x255   :  { %v2217_v22 = vpop.f32.mrf.mxu1  ;;  %2263 = vmatmul.mubr.f32.gmra.mxu0 %v746_v36 }
 0x256   :  { %v621_v51 = vadd.f32 %v3074_v45, %v598_v50  ;;  %v601_v52 = vmul.f32 %v2217_v22, %v568_v46  ;;  %v747_v40 = vmul.f32 %v3049_v25, %v635_v34  ;;  %v638_v23 = vmax.f32 %v622_v49, 0.0 }
 0x257   :  { %v465_v53 = vpop.f32.mrf.mxu1 }
 0x258   :  { %v637_v54 = vmax.f32 %v621_v51, 0.0  ;;  %v624_v55 = vadd.f32 %v3074_v45, %v601_v52  ;;  %v600_v56 = vmul.f32 %v3051_v27, %v465_v53  ;;  %2265 = vmatprep.mubr.f32.mxu0 %v747_v40  ;;  %v750_v42 = vmul.f32 %v3080_v57, %v638_v23  ;;  %v729_v8 = vpop.permute.xlu1 %728 }
 0x259   :  { %v2220_v59 = vpop.f32.mrf.mxu1  ;;  %2266 = vmatmul.mubr.f32.gmra.mxu0 %v748_v38 }
 0x25a   :  { %v623_v61 = vadd.f32 %v3074_v45, %v600_v56  ;;  %v603_v46 = vmul.f32 %v2220_v59, %v578_v9  ;;  %v749_v25 = vmul.f32 %v3053_v29, %v637_v54  ;;  %v640_v62 = vmax.f32 %v624_v55, 0.0  ;;  %v3112_v9 = vpop.permute.xlu0 %1102  ;;  %v919_v56 = vld [vmem:[%s3399_s6 + $0x8] sm:$0xff]  ;;  %v920_v59 = vld [vmem:[%s3399_s6 + $0x10] sm:$0xff] }
 0x25b   :  { %v475_v63 = vpop.f32.mrf.mxu1 }
 0x25c   :  { %v639_v0 = vmax.f32 %v623_v61, 0.0  ;;  %v626_v1 = vadd.f32 %v3074_v45, %v603_v46  ;;  %v602_v27 = vmul.f32 %v3055_v31, %v475_v63  ;;  %2268 = vmatprep.mubr.f32.mxu0 %v749_v25  ;;  %v752_v29 = vmul.f32 %v719_v21, %v640_v62  ;;  %v739_v18 = vpop.permute.xlu1 %738  ;;  %v921_v61 = vld [vmem:[%s3399_s6 + $0x18] sm:$0xff]  ;;  %v922_v46 = vld [vmem:[%s3399_s6 + $0x20] sm:$0xff]  ;;  %v923_v25 = vld [vmem:[%s3399_s6 + $0x28] sm:$0xff] }
 0x25d   :  { %v2223_v2 = vpop.f32.mrf.mxu1  ;;  %2269 = vmatmul.mubr.f32.gmra.mxu0 %v750_v42  ;;  %v1230_v31 = vlaneseq  ;;  %v924_v62 = vld [vmem:[%s3399_s6 + $0x30] sm:$0xff]  ;;  %v925_v42 = vld [vmem:[%s3399_s6 + $0x38] sm:$0xff] }
 0x25e   :  { %v625_v3 = vadd.f32 %v3074_v45, %v602_v27  ;;  %v605_v4 = vmul.f32 %v2223_v2, %v588_v24  ;;  %v751_v5 = vmul.f32 %v3057_v33, %v639_v0  ;;  %v642_v6 = vmax.f32 %v626_v1, 0.0  ;;  %v1250_v19 = vpop.permute.xlu0 %1249  ;;  %v926_v0 = vld [vmem:[%s3399_s6 + $0x40] sm:$0xff]  ;;  %v927_v27 = vld [vmem:[%s3399_s6 + $0x48] sm:$0xff]  ;;  %v928_v2 = vld [vmem:[%s3399_s6 + $0x50] sm:$0xff] }
 0x25f   :  { %v485_v7 = vpop.f32.mrf.mxu1  ;;  %v3118_v17 = vand.u32 127, %v1230_v31 }
 0x260   :  { %v641_v57 = vmax.f32 %v625_v3, 0.0  ;;  %v628_v11 = vadd.f32 %v3074_v45, %v605_v4  ;;  %v604_v12 = vmul.f32 %v3059_v35, %v485_v7  ;;  %2271 = vmatprep.mubr.f32.mxu0 %v751_v5  ;;  %v754_v33 = vmul.f32 %v729_v8, %v642_v6  ;;  %v3126_v53 = vpop.permute.xlu1 %1167  ;;  %v929_v3 = vld [vmem:[%s3399_s6 + $0x58] sm:$0xff]  ;;  %v930_v4 = vld [vmem:[%s3399_s6 + $0x60] sm:$0xff]  ;;  %v931_v6 = vld [vmem:[%s3399_s6 + $0x68] sm:$0xff] }
 0x261   :  { %2272 = vmatmul.mubr.f32.gmra.mxu0 %v752_v29  ;;  %vm1296_vm0 = vcmp.eq.s32.totalorder %v3118_v17, %v1250_v19  ;;  %v2490_v35 = vmov 1.0   ;;  %v932_v7 = vld [vmem:[%s3399_s6 + $0x70] sm:$0xff]  ;;  %v933_v8 = vld [vmem:[%s3399_s6 + $0x78] sm:$0xff] }
 0x262   :  { %v627_v13 = vadd.f32 %v3074_v45, %v604_v12  ;;  %v753_v14 = vmul.f32 %v3061_v37, %v641_v57  ;;  %v644_v15 = vmax.f32 %v628_v11, 0.0  ;;  %v918_v37 = vld [vmem:[%s3399_s6] sm:$0xff] }
 0x263   :  { %2312 = vmatprep.mubr.f32.mxu1 %v918_v37 }
 0x264   :  { %v643_v16 = vmax.f32 %v627_v13, 0.0  ;;  %2274 = vmatprep.mubr.f32.mxu0 %v753_v14  ;;  %v756_v26 = vmul.f32 %v739_v18, %v644_v15  ;;  %v3128_v38 = vpop.permute.xlu1 %1157  ;;  %v3199_v14 = vpop.permute.xlu0 %1252 }
 0x265   :  { %2275 = vmatmul.mubr.f32.gmra.mxu0 %v754_v33  ;;  %vm1297_vm3 = vcmp.eq.s32.totalorder %v3118_v17, %v3199_v14 }
 0x266   :  { %v755_v20 = vmul.f32 %v3063_v39, %v643_v16 }
 0x268   :  { %2277 = vmatprep.mubr.f32.mxu0 %v755_v20  ;;  %v3130_v54 = vpop.permute.xlu1 %1147  ;;  %v3207_v19 = vpop.permute.xlu0 %1255 }
 0x269   :  { %2278 = vmatmul.mubr.f32.gmra.mxu0 %v756_v26  ;;  %vm1298_vm5 = vcmp.eq.s32.totalorder %v3118_v17, %v3207_v19 }
 0x26a   :  { %2368 = vmatprep.mubr.msk.f32.mxu0 %vm1296_vm0, %v2490_v35 }
 0x26c   :  { %v3132_v55 = vpop.permute.xlu1 %1137 }
 0x270   :  { %v3140_v24 = vpop.permute.xlu1 %1127 }
 0x274   :  { %v3154_v63 = vpop.permute.xlu1 %1117 }
 0x278   :  { %v3162_v1 = vpop.permute.xlu1 %1107 }
 0x27c   :  { %v3176_v5 = vpop.permute.xlu1 %1097 }
 0x280   :  { %v1362_v29 = vpop.permute.xlu1 %1361 }
 0x281   :  { %vm1408_vm1 = vcmp.eq.s32.totalorder %v3118_v17, %v1362_v29 }
 0x284   :  { %v3197_v13 = vpop.permute.xlu1 %1364 }
 0x285   :  { %vm1409_vm2 = vcmp.eq.s32.totalorder %v3118_v17, %v3197_v13 }
 0x288   :  { %v3205_v18 = vpop.permute.xlu1 %1367 }
 0x289   :  { %vm1410_vm4 = vcmp.eq.s32.totalorder %v3118_v17, %v3205_v18 }
 0x30d   :  { %v2258_v45 = vpop.f32.mrf.mxu0 }
 0x30f   :  { %v839_v28 = vpop.f32.mrf.mxu0 }
 0x311   :  { %v2261_v30 = vpop.f32.mrf.mxu0 }
 0x313   :  { %v849_v32 = vpop.f32.mrf.mxu0 }
 0x315   :  { %v2264_v44 = vpop.f32.mrf.mxu0 }
 0x317   :  { %v859_v36 = vpop.f32.mrf.mxu0 }
 0x319   :  { %v2267_v39 = vpop.f32.mrf.mxu0 }
 0x31b   :  { %v869_v21 = vpop.f32.mrf.mxu0 }
 0x31d   :  { %v2270_v34 = vpop.f32.mrf.mxu0 }
 0x31f   :  { %v879_v49 = vpop.f32.mrf.mxu0 }
 0x321   :  { %v2273_v50 = vpop.f32.mrf.mxu0 }
 0x323   :  { %v889_v22 = vpop.f32.mrf.mxu0 }
 0x325   :  { %v2276_v51 = vpop.f32.mrf.mxu0 }
 0x327   :  { %v899_v52 = vpop.f32.mrf.mxu0 }
 0x329   :  { %v2279_v40 = vpop.f32.mrf.mxu0 }
 0x32a   :  { %2280 = vmatprep.subr.mxu1 %v2279_v40 }
 0x32b   :  { %v909_v23 = vpop.f32.mrf.mxu0  ;;  %2281 = vmatpush3.msra.mxu1 %v2279_v40 }
 0x32c   :  { %2282 = vmatprep.subr.mxu1 %v909_v23 }
 0x32d   :  { %2283 = vmatpush3.msra.mxu1 %v909_v23 }
 0x32e   :  { %2284 = vmatprep.subr.mxu1 %v2276_v51 }
 0x32f   :  { %2285 = vmatpush3.msra.mxu1 %v2276_v51 }
 0x330   :  { %2286 = vmatprep.subr.mxu1 %v899_v52 }
 0x331   :  { %2287 = vmatpush3.msra.mxu1 %v899_v52 }
 0x332   :  { %2288 = vmatprep.subr.mxu1 %v2273_v50 }
 0x333   :  { %2289 = vmatpush3.msra.mxu1 %v2273_v50 }
 0x334   :  { %2290 = vmatprep.subr.mxu1 %v889_v22 }
 0x335   :  { %2291 = vmatpush3.msra.mxu1 %v889_v22  ;;  %v3222_v22 = vld [vmem:[%s3400_s8] ss:$0 sm:$0xff] }
 0x336   :  { %2292 = vmatprep.subr.mxu1 %v2270_v34 }
 0x337   :  { %2293 = vmatpush3.msra.mxu1 %v2270_v34 }
 0x338   :  { %2294 = vmatprep.subr.mxu1 %v879_v49 }
 0x339   :  { %2295 = vmatpush3.msra.mxu1 %v879_v49 }
 0x33a   :  { %2296 = vmatprep.subr.mxu1 %v2267_v39 }
 0x33b   :  { %2297 = vmatpush3.msra.mxu1 %v2267_v39 }
 0x33c   :  { %2298 = vmatprep.subr.mxu1 %v869_v21 }
 0x33d   :  { %2299 = vmatpush3.msra.mxu1 %v869_v21 }
 0x33e   :  { %2300 = vmatprep.subr.mxu1 %v2264_v44 }
 0x33f   :  { %2301 = vmatpush3.msra.mxu1 %v2264_v44 }
 0x340   :  { %2302 = vmatprep.subr.mxu1 %v859_v36 }
 0x341   :  { %2303 = vmatpush3.msra.mxu1 %v859_v36 }
 0x342   :  { %2304 = vmatprep.subr.mxu1 %v2261_v30 }
 0x343   :  { %2305 = vmatpush3.msra.mxu1 %v2261_v30 }
 0x344   :  { %2306 = vmatprep.subr.mxu1 %v849_v32 }
 0x345   :  { %2307 = vmatpush3.msra.mxu1 %v849_v32 }
 0x346   :  { %2308 = vmatprep.subr.mxu1 %v2258_v45 }
 0x347   :  { %2309 = vmatpush3.msra.mxu1 %v2258_v45  ;;  %v3209_v45 = vpop.permute.xlu1 %1370 }
 0x348   :  { %2310 = vmatprep.subr.mxu1 %v839_v28  ;;  %vm1411_vm6 = vcmp.eq.s32.totalorder %v3118_v17, %v3209_v45 }
 0x349   :  { %2311 = vmatpush3.msra.mxu1 %v839_v28  ;;  %v3211_v28 = vpop.permute.xlu0 %1258 }
 0x34a   :  { %2313 = vmatmul.mubr.f32.vlgmr.msra.gmra.mxu1 %v919_v56  ;;  %vm1299_vm7 = vcmp.eq.s32.totalorder %v3118_v17, %v3211_v28 }
 0x34b   :  { %2315 = vmatprep.mubr.f32.mxu1 %v920_v59  ;;  %v3213_v36 = vpop.permute.xlu1 %1373 }
 0x34c   :  { %vm1412_vm8 = vcmp.eq.s32.totalorder %v3118_v17, %v3213_v36 }
 0x34d   :  { %v3215_v39 = vpop.permute.xlu0 %1261 }
 0x34e   :  { %2316 = vmatmul.mubr.f32.gmra.mxu1 %v921_v61  ;;  %vm1300_vm9 = vcmp.eq.s32.totalorder %v3118_v17, %v3215_v39 }
 0x34f   :  { %2318 = vmatprep.mubr.f32.mxu1 %v922_v46  ;;  %v3224_v52 = vpop.permute.xlu1 %1376 }
 0x350   :  { %vm1413_vm10 = vcmp.eq.s32.totalorder %v3118_v17, %v3224_v52  ;;  %v2491_v52 = vmov 0.0  }
 0x351   :  { %v3226_v40 = vpop.permute.xlu0 %1264 }
 0x352   :  { %2319 = vmatmul.mubr.f32.gmra.mxu1 %v923_v25  ;;  %vm1301_vm11 = vcmp.eq.s32.totalorder %v3118_v17, %v3226_v40 }
 0x353   :  { %2321 = vmatprep.mubr.f32.mxu1 %v924_v62 }
 0x356   :  { %2322 = vmatmul.mubr.f32.gmra.mxu1 %v925_v42 }
 0x357   :  { %2324 = vmatprep.mubr.f32.mxu1 %v926_v0  ;;  %v3238_v0 = vpop.permute.xlu0 %1267 }
 0x358   :  { %vm1302_vm13 = vcmp.eq.s32.totalorder %v3118_v17, %v3238_v0 }
 0x35a   :  { %2325 = vmatmul.mubr.f32.gmra.mxu1 %v927_v27 }
 0x35b   :  { %2327 = vmatprep.mubr.f32.mxu1 %v928_v2  ;;  %v3248_v29 = vpop.permute.xlu0 %1270 }
 0x35c   :  { %vm1303_vm15 = vcmp.eq.s32.totalorder %v3118_v17, %v3248_v29 }
 0x35e   :  { %2328 = vmatmul.mubr.f32.gmra.mxu1 %v929_v3 }
 0x35f   :  { %2330 = vmatprep.mubr.f32.mxu1 %v930_v4 }
 0x362   :  { %2331 = vmatmul.mubr.f32.gmra.mxu1 %v931_v6 }
 0x363   :  { %2333 = vmatprep.mubr.f32.mxu1 %v932_v7 }
 0x366   :  { %2334 = vmatmul.mubr.f32.gmra.mxu1 %v933_v8 }
 0x367   :  { %2424 = vmatprep.mubr.msk.f32.mxu1 %vm1408_vm1, %v2490_v35 }
 0x40a   :  { %v3189_v57 = vpop.f32.mrf.mxu1 }
 0x40c   :  { %v3191_v11 = vpop.f32.mrf.mxu1 }
 0x40e   :  { %v3193_v12 = vpop.f32.mrf.mxu1 }
 0x410   :  { %v3195_v31 = vpop.f32.mrf.mxu1 }
 0x412   :  { %v3201_v15 = vpop.f32.mrf.mxu1 }
 0x414   :  { %v3203_v33 = vpop.f32.mrf.mxu1 }
 0x416   :  { %v2323_v16 = vpop.f32.mrf.mxu1 }
 0x417   :  { %v1182_v4 = vmul.f32 %v2323_v16, %v3087_v10  ;;  %v1180_v10 = vmul.f32 %v3201_v15, %v3094_v48  ;;  %v3260_v48 = vpop.permute.xlu0 %1273  ;;  %v1178_v15 = vmul.f32 %v3193_v12, %v3103_v60  ;;  %v1176_v60 = vmul.f32 %v3189_v57, %v3112_v9 }
 0x418   :  { %v1030_v20 = vpop.f32.mrf.mxu1  ;;  %vm1304_vm1 = vcmp.eq.s32.totalorder %v3118_v17, %v3260_v48 }
 0x419   :  { %v1205_v16 = vadd.f32 %v3222_v22, %v1182_v4  ;;  %v1201_v12 = vadd.f32 %v3222_v22, %v1178_v15  ;;  %v1199_v9 = vadd.f32 %v3222_v22, %v1176_v60 }
 0x41a   :  { %v2326_v26 = vpop.f32.mrf.mxu1 }
 0x41b   :  { %v1217_v57 = vmax.f32 %v1201_v12, 0.0 }
 0x41c   :  { %v1040_v37 = vpop.f32.mrf.mxu1 }
 0x41e   :  { %v2329_v30 = vpop.f32.mrf.mxu1 }
 0x420   :  { %v1050_v32 = vpop.f32.mrf.mxu1 }
 0x421   :  { %v1185_v25 = vmul.f32 %v3130_v54, %v1050_v32  ;;  %v1183_v54 = vmul.f32 %v3132_v55, %v1040_v37  ;;  %v1181_v55 = vmul.f32 %v3140_v24, %v1030_v20  ;;  %v1179_v24 = vmul.f32 %v3154_v63, %v3203_v33 }
 0x422   :  { %v2332_v44 = vpop.f32.mrf.mxu1  ;;  %v1177_v63 = vmul.f32 %v3162_v1, %v3195_v31  ;;  %v3273_v1 = vpop.permute.xlu0 %1276  ;;  %v1175_v31 = vmul.f32 %v3176_v5, %v3191_v11 }
 0x423   :  { %v1188_v49 = vmul.f32 %v2332_v44, %v3069_v43  ;;  %v1186_v43 = vmul.f32 %v2329_v30, %v3076_v47  ;;  %v1184_v47 = vmul.f32 %v2326_v26, %v3082_v58  ;;  %v1208_v2 = vadd.f32 %v3222_v22, %v1185_v25 }
 0x424   :  { %v1060_v21 = vpop.f32.mrf.mxu1  ;;  %v1206_v8 = vadd.f32 %v3222_v22, %v1183_v54  ;;  %v1204_v20 = vadd.f32 %v3222_v22, %v1181_v55  ;;  %v1203_v44 = vadd.f32 %v3222_v22, %v1180_v10  ;;  %v1202_v33 = vadd.f32 %v3222_v22, %v1179_v24 }
 0x425   :  { %v1187_v23 = vmul.f32 %v3128_v38, %v1060_v21  ;;  %v3236_v38 = vpop.permute.xlu1 %1379  ;;  %v1207_v58 = vadd.f32 %v3222_v22, %v1184_v47  ;;  %v1224_v26 = vmax.f32 %v1208_v2, 0.0  ;;  %v1221_v21 = vmax.f32 %v1205_v16, 0.0 }
 0x426   :  { %v2335_v34 = vpop.f32.mrf.mxu1  ;;  %v1222_v30 = vmax.f32 %v1206_v8, 0.0  ;;  %v1280_v11 = vpop.permute.xlu0 %1279  ;;  %vm1414_vm12 = vcmp.eq.s32.totalorder %v3118_v17, %v3236_v38 }
 0x427   :  { %v1190_v50 = vmul.f32 %v2335_v34, %v3065_v41  ;;  %v1211_v41 = vadd.f32 %v3222_v22, %v1188_v49  ;;  %v1210_v62 = vadd.f32 %v3222_v22, %v1187_v23  ;;  %v1223_v37 = vmax.f32 %v1207_v58, 0.0 }
 0x428   :  { %v1070_v51 = vpop.f32.mrf.mxu1  ;;  %v1220_v34 = vmax.f32 %v1204_v20, 0.0  ;;  %v1219_v49 = vmax.f32 %v1203_v44, 0.0  ;;  %v1218_v23 = vmax.f32 %v1202_v33, 0.0 }
 0x429   :  { %v1213_v56 = vadd.f32 %v3222_v22, %v1190_v50  ;;  %v1189_v59 = vmul.f32 %v3126_v53, %v1070_v51  ;;  %v1209_v53 = vadd.f32 %v3222_v22, %v1186_v43  ;;  %v1227_v27 = vmax.f32 %v1211_v41, 0.0  ;;  %v3246_v7 = vpop.permute.xlu1 %1382 }
 0x42a   :  { %v1226_v3 = vmax.f32 %v1210_v62, 0.0  ;;  %v1200_v51 = vadd.f32 %v3222_v22, %v1177_v63  ;;  %v1215_v43 = vmax.f32 %v1199_v9, 0.0  ;;  %vm1415_vm14 = vcmp.eq.s32.totalorder %v3118_v17, %v3246_v7 }
 0x42b   :  { %v1229_v61 = vmax.f32 %v1213_v56, 0.0  ;;  %v1212_v46 = vadd.f32 %v3222_v22, %v1189_v59  ;;  %v1225_v6 = vmax.f32 %v1209_v53, 0.0  ;;  %v1198_v56 = vadd.f32 %v3222_v22, %v1175_v31 }
 0x42c   :  { %v1216_v59 = vmax.f32 %v1200_v51, 0.0 }
 0x42d   :  { %v1228_v42 = vmax.f32 %v1212_v46, 0.0  ;;  %2336 = vmatprep.subr.mxu0 %v1229_v61  ;;  %2392 = vmatprep.subr.mxu1 %v1229_v61  ;;  %v3258_v32 = vpop.permute.xlu1 %1385  ;;  %v1214_v41 = vmax.f32 %v1198_v56, 0.0 }
 0x42e   :  { %2337 = vmatpush3.msra.mxu0 %v1229_v61  ;;  %2393 = vmatpush3.msra.mxu1 %v1229_v61  ;;  %v1283_v61 = vpop.permute.xlu0 %1282  ;;  %vm1416_vm0 = vcmp.eq.s32.totalorder %v3118_v17, %v3258_v32 }
 0x42f   :  { %2338 = vmatprep.subr.mxu0 %v1228_v42  ;;  %2394 = vmatprep.subr.mxu1 %v1228_v42 }
 0x430   :  { %2339 = vmatpush3.msra.mxu0 %v1228_v42  ;;  %2395 = vmatpush3.msra.mxu1 %v1228_v42 }
 0x431   :  { %2340 = vmatprep.subr.mxu0 %v1227_v27  ;;  %2396 = vmatprep.subr.mxu1 %v1227_v27  ;;  %v3271_v50 = vpop.permute.xlu1 %1388 }
 0x432   :  { %2341 = vmatpush3.msra.mxu0 %v1227_v27  ;;  %2397 = vmatpush3.msra.mxu1 %v1227_v27  ;;  %v1286_v14 = vpop.permute.xlu0 %1285 }
 0x433   :  { %2342 = vmatprep.subr.mxu0 %v1226_v3  ;;  %2398 = vmatprep.subr.mxu1 %v1226_v3 }
 0x434   :  { %2343 = vmatpush3.msra.mxu0 %v1226_v3  ;;  %2399 = vmatpush3.msra.mxu1 %v1226_v3 }
 0x435   :  { %2344 = vmatprep.subr.mxu0 %v1225_v6  ;;  %2400 = vmatprep.subr.mxu1 %v1225_v6  ;;  %v1392_v5 = vpop.permute.xlu1 %1391 }
 0x436   :  { %2345 = vmatpush3.msra.mxu0 %v1225_v6  ;;  %2401 = vmatpush3.msra.mxu1 %v1225_v6  ;;  %v1289_v19 = vpop.permute.xlu0 %1288 }
 0x437   :  { %2346 = vmatprep.subr.mxu0 %v1224_v26  ;;  %2402 = vmatprep.subr.mxu1 %v1224_v26 }
 0x438   :  { %2347 = vmatpush3.msra.mxu0 %v1224_v26  ;;  %2403 = vmatpush3.msra.mxu1 %v1224_v26 }
 0x439   :  { %2348 = vmatprep.subr.mxu0 %v1223_v37  ;;  %2404 = vmatprep.subr.mxu1 %v1223_v37  ;;  %v1395_v22 = vpop.permute.xlu1 %1394 }
 0x43a   :  { %2349 = vmatpush3.msra.mxu0 %v1223_v37  ;;  %2405 = vmatpush3.msra.mxu1 %v1223_v37  ;;  %v1292_v28 = vpop.permute.xlu0 %1291 }
 0x43b   :  { %2350 = vmatprep.subr.mxu0 %v1222_v30  ;;  %2406 = vmatprep.subr.mxu1 %v1222_v30 }
 0x43c   :  { %2351 = vmatpush3.msra.mxu0 %v1222_v30  ;;  %2407 = vmatpush3.msra.mxu1 %v1222_v30 }
 0x43d   :  { %2352 = vmatprep.subr.mxu0 %v1221_v21  ;;  %2408 = vmatprep.subr.mxu1 %v1221_v21  ;;  %v1398_v13 = vpop.permute.xlu1 %1397 }
 0x43e   :  { %2353 = vmatpush3.msra.mxu0 %v1221_v21  ;;  %2409 = vmatpush3.msra.mxu1 %v1221_v21  ;;  %v1295_v39 = vpop.permute.xlu0 %1294 }
 0x43f   :  { %2354 = vmatprep.subr.mxu0 %v1220_v34  ;;  %2410 = vmatprep.subr.mxu1 %v1220_v34 }
 0x440   :  { %2355 = vmatpush3.msra.mxu0 %v1220_v34  ;;  %2411 = vmatpush3.msra.mxu1 %v1220_v34 }
 0x441   :  { %2356 = vmatprep.subr.mxu0 %v1219_v49  ;;  %2412 = vmatprep.subr.mxu1 %v1219_v49  ;;  %v1401_v18 = vpop.permute.xlu1 %1400 }
 0x442   :  { %2357 = vmatpush3.msra.mxu0 %v1219_v49  ;;  %2413 = vmatpush3.msra.mxu1 %v1219_v49 }
 0x443   :  { %2358 = vmatprep.subr.mxu0 %v1218_v23  ;;  %2414 = vmatprep.subr.mxu1 %v1218_v23 }
 0x444   :  { %2359 = vmatpush3.msra.mxu0 %v1218_v23  ;;  %2415 = vmatpush3.msra.mxu1 %v1218_v23 }
 0x445   :  { %2360 = vmatprep.subr.mxu0 %v1217_v57  ;;  %2416 = vmatprep.subr.mxu1 %v1217_v57  ;;  %v1404_v45 = vpop.permute.xlu1 %1403 }
 0x446   :  { %2361 = vmatpush3.msra.mxu0 %v1217_v57  ;;  %2417 = vmatpush3.msra.mxu1 %v1217_v57 }
 0x447   :  { %2362 = vmatprep.subr.mxu0 %v1216_v59  ;;  %2418 = vmatprep.subr.mxu1 %v1216_v59 }
 0x448   :  { %2363 = vmatpush3.msra.mxu0 %v1216_v59  ;;  %2419 = vmatpush3.msra.mxu1 %v1216_v59 }
 0x449   :  { %2364 = vmatprep.subr.mxu0 %v1215_v43  ;;  %2420 = vmatprep.subr.mxu1 %v1215_v43  ;;  %v1407_v36 = vpop.permute.xlu1 %1406 }
 0x44a   :  { %2365 = vmatpush3.msra.mxu0 %v1215_v43  ;;  %2421 = vmatpush3.msra.mxu1 %v1215_v43 }
 0x44b   :  { %2366 = vmatprep.subr.mxu0 %v1214_v41  ;;  %2422 = vmatprep.subr.mxu1 %v1214_v41 }
 0x44c   :  { %2367 = vmatpush3.msra.mxu0 %v1214_v41  ;;  %2423 = vmatpush3.msra.mxu1 %v1214_v41 }
 0x44d   :  { %2369 = vmatmul.mubr.msk.f32.vlgmr.msra.gmra.mxu0 %vm1297_vm3, %v2490_v35  ;;  %2425 = vmatmul.mubr.msk.f32.vlgmr.msra.gmra.mxu1 %vm1409_vm2, %v2490_v35  ;;  %vm1417_vm2 = vcmp.eq.s32.totalorder %v3118_v17, %v3271_v50  ;;  %vm1305_vm3 = vcmp.eq.s32.totalorder %v3118_v17, %v3273_v1 }
 0x44e   :  { %2371 = vmatprep.mubr.msk.f32.mxu0 %vm1298_vm5, %v2490_v35  ;;  %2427 = vmatprep.mubr.msk.f32.mxu1 %vm1410_vm4, %v2490_v35  ;;  %vm1418_vm4 = vcmp.eq.s32.totalorder %v3118_v17, %v1392_v5  ;;  %vm1306_vm5 = vcmp.eq.s32.totalorder %v3118_v17, %v1280_v11 }
 0x44f   :  { %2448 = vmatprep.subr.mxu0 %v2491_v52 }
 0x451   :  { %2372 = vmatmul.mubr.msk.f32.gmra.mxu0 %vm1299_vm7, %v2490_v35  ;;  %2428 = vmatmul.mubr.msk.f32.gmra.mxu1 %vm1411_vm6, %v2490_v35  ;;  %vm1419_vm6 = vcmp.eq.s32.totalorder %v3118_v17, %v1395_v22  ;;  %vm1307_vm7 = vcmp.eq.s32.totalorder %v3118_v17, %v1283_v61 }
 0x452   :  { %2374 = vmatprep.mubr.msk.f32.mxu0 %vm1300_vm9, %v2490_v35  ;;  %2430 = vmatprep.mubr.msk.f32.mxu1 %vm1412_vm8, %v2490_v35  ;;  %vm1420_vm8 = vcmp.eq.s32.totalorder %v3118_v17, %v1398_v13  ;;  %vm1308_vm9 = vcmp.eq.s32.totalorder %v3118_v17, %v1286_v14 }
 0x455   :  { %2375 = vmatmul.mubr.msk.f32.gmra.mxu0 %vm1301_vm11, %v2490_v35  ;;  %2431 = vmatmul.mubr.msk.f32.gmra.mxu1 %vm1413_vm10, %v2490_v35  ;;  %vm1421_vm10 = vcmp.eq.s32.totalorder %v3118_v17, %v1401_v18  ;;  %vm1309_vm11 = vcmp.eq.s32.totalorder %v3118_v17, %v1289_v19 }
 0x456   :  { %2377 = vmatprep.mubr.msk.f32.mxu0 %vm1302_vm13, %v2490_v35  ;;  %2433 = vmatprep.mubr.msk.f32.mxu1 %vm1414_vm12, %v2490_v35  ;;  %vm1422_vm12 = vcmp.eq.s32.totalorder %v3118_v17, %v1404_v45  ;;  %vm1310_vm13 = vcmp.eq.s32.totalorder %v3118_v17, %v1292_v28 }
 0x459   :  { %2378 = vmatmul.mubr.msk.f32.gmra.mxu0 %vm1303_vm15, %v2490_v35  ;;  %2434 = vmatmul.mubr.msk.f32.gmra.mxu1 %vm1415_vm14, %v2490_v35  ;;  %vm1423_vm14 = vcmp.eq.s32.totalorder %v3118_v17, %v1407_v36  ;;  %vm1311_vm15 = vcmp.eq.s32.totalorder %v3118_v17, %v1295_v39 }
 0x45a   :  { %2380 = vmatprep.mubr.msk.f32.mxu0 %vm1304_vm1, %v2490_v35  ;;  %2436 = vmatprep.mubr.msk.f32.mxu1 %vm1416_vm0, %v2490_v35  ;;  %vm2492_vm0 = vmmov 0  }
 0x45d   :  { %2381 = vmatmul.mubr.msk.f32.gmra.mxu0 %vm1305_vm3, %v2490_v35  ;;  %2437 = vmatmul.mubr.msk.f32.gmra.mxu1 %vm1417_vm2, %v2490_v35 }
 0x45e   :  { %2383 = vmatprep.mubr.msk.f32.mxu0 %vm1306_vm5, %v2490_v35  ;;  %2439 = vmatprep.mubr.msk.f32.mxu1 %vm1418_vm4, %v2490_v35 }
 0x461   :  { %2384 = vmatmul.mubr.msk.f32.gmra.mxu0 %vm1307_vm7, %v2490_v35  ;;  %2440 = vmatmul.mubr.msk.f32.gmra.mxu1 %vm1419_vm6, %v2490_v35 }
 0x462   :  { %2386 = vmatprep.mubr.msk.f32.mxu0 %vm1308_vm9, %v2490_v35  ;;  %2442 = vmatprep.mubr.msk.f32.mxu1 %vm1420_vm8, %v2490_v35 }
 0x465   :  { %2387 = vmatmul.mubr.msk.f32.gmra.mxu0 %vm1309_vm11, %v2490_v35  ;;  %2443 = vmatmul.mubr.msk.f32.gmra.mxu1 %vm1421_vm10, %v2490_v35 }
 0x466   :  { %2389 = vmatprep.mubr.msk.f32.mxu0 %vm1310_vm13, %v2490_v35  ;;  %2445 = vmatprep.mubr.msk.f32.mxu1 %vm1422_vm12, %v2490_v35 }
 0x469   :  { %2390 = vmatmul.mubr.msk.f32.gmra.mxu0 %vm1311_vm15, %v2490_v35  ;;  %2446 = vmatmul.mubr.msk.f32.gmra.mxu1 %vm1423_vm14, %v2490_v35 }
 0x46a   :  { %2480 = vmatprep.mubr.msk.f32.mxu0 %vm2492_vm0, %v2491_v52 }
 0x50d   :  { %v2370_v40 = vpop.f32.mrf.mxu0  ;;  %v2426_v46 = vpop.f32.mrf.mxu1 }
 0x50e   :  { %v3360_v25 = vmul.f32 %v2426_v46, %v2370_v40 }
 0x50f   :  { %v1522_v62 = vpop.f32.mrf.mxu0  ;;  %v1667_v42 = vpop.f32.mrf.mxu1 }
 0x510   :  { %v3362_v38 = vmul.f32 %v1667_v42, %v1522_v62 }
 0x511   :  { %v2373_v0 = vpop.f32.mrf.mxu0  ;;  %v2429_v17 = vpop.f32.mrf.mxu1 }
 0x512   :  { %v3364_v47 = vmul.f32 %v2429_v17, %v2373_v0 }
 0x513   :  { %v1532_v53 = vpop.f32.mrf.mxu0  ;;  %v1677_v27 = vpop.f32.mrf.mxu1 }
 0x514   :  { %v1748_v54 = vmul.f32 %v1677_v27, %v1532_v53 }
 0x515   :  { %v2376_v2 = vpop.f32.mrf.mxu0  ;;  %v2432_v3 = vpop.f32.mrf.mxu1 }
 0x516   :  { %v1751_v56 = vmul.f32 %v2432_v3, %v2376_v2 }
 0x517   :  { %v1542_v4 = vpop.f32.mrf.mxu0  ;;  %v1687_v58 = vpop.f32.mrf.mxu1 }
 0x518   :  { %v1750_v59 = vmul.f32 %v1687_v58, %v1542_v4 }
 0x519   :  { %v2379_v6 = vpop.f32.mrf.mxu0  ;;  %v2435_v7 = vpop.f32.mrf.mxu1 }
 0x51a   :  { %v1753_v9 = vmul.f32 %v2435_v7, %v2379_v6 }
 0x51b   :  { %v1552_v29 = vpop.f32.mrf.mxu0  ;;  %v1697_v55 = vpop.f32.mrf.mxu1 }
 0x51c   :  { %v1752_v57 = vmul.f32 %v1697_v55, %v1552_v29 }
 0x51d   :  { %v2382_v8 = vpop.f32.mrf.mxu0  ;;  %v2438_v26 = vpop.f32.mrf.mxu1 }
 0x51e   :  { %v1755_v51 = vmul.f32 %v2438_v26, %v2382_v8 }
 0x51f   :  { %v1562_v10 = vpop.f32.mrf.mxu0  ;;  %v1707_v16 = vpop.f32.mrf.mxu1 }
 0x520   :  { %v1754_v23 = vmul.f32 %v1707_v16, %v1562_v10 }
 0x521   :  { %v2385_v37 = vpop.f32.mrf.mxu0  ;;  %v2441_v24 = vpop.f32.mrf.mxu1 }
 0x522   :  { %v1757_v1 = vmul.f32 %v2441_v24, %v2385_v37 }
 0x523   :  { %v1572_v20 = vpop.f32.mrf.mxu0  ;;  %v1717_v30 = vpop.f32.mrf.mxu1 }
 0x524   :  { %v1756_v31 = vmul.f32 %v1717_v30, %v1572_v20 }
 0x525   :  { %v2388_v32 = vpop.f32.mrf.mxu0  ;;  %v2444_v48 = vpop.f32.mrf.mxu1 }
 0x526   :  { %v1759_v49 = vmul.f32 %v2444_v48, %v2388_v32 }
 0x527   :  { %v1582_v15 = vpop.f32.mrf.mxu0  ;;  %v1727_v44 = vpop.f32.mrf.mxu1 }
 0x528   :  { %v1758_v50 = vmul.f32 %v1727_v44, %v1582_v15 }
 0x529   :  { %v2391_v21 = vpop.f32.mrf.mxu0  ;;  %v2447_v63 = vpop.f32.mrf.mxu1 }
 0x52a   :  { %v1761_v33 = vmul.f32 %v2447_v63, %v2391_v21 }
 0x52b   :  { %v1592_v34 = vpop.f32.mrf.mxu0  ;;  %v1737_v60 = vpop.f32.mrf.mxu1 }
 0x52c   :  { %2449 = vmatpush3.xpose.msra.mxu0 %v1761_v33  ;;  %v1760_v12 = vmul.f32 %v1737_v60, %v1592_v34 }
 0x52d   :  { %2450 = vmatprep.subr.mxu0 %v2491_v52 }
 0x530   :  { %2451 = vmatpush3.xpose.msra.mxu0 %v1760_v12 }
 0x531   :  { %2452 = vmatprep.subr.mxu0 %v2491_v52 }
 0x534   :  { %2453 = vmatpush3.xpose.msra.mxu0 %v1759_v49 }
 0x535   :  { %2454 = vmatprep.subr.mxu0 %v2491_v52 }
 0x538   :  { %2455 = vmatpush3.xpose.msra.mxu0 %v1758_v50 }
 0x539   :  { %2456 = vmatprep.subr.mxu0 %v2491_v52 }
 0x53c   :  { %2457 = vmatpush3.xpose.msra.mxu0 %v1757_v1 }
 0x53d   :  { %2458 = vmatprep.subr.mxu0 %v2491_v52 }
 0x540   :  { %2459 = vmatpush3.xpose.msra.mxu0 %v1756_v31 }
 0x541   :  { %2460 = vmatprep.subr.mxu0 %v2491_v52 }
 0x544   :  { %2461 = vmatpush3.xpose.msra.mxu0 %v1755_v51 }
 0x545   :  { %2462 = vmatprep.subr.mxu0 %v2491_v52 }
 0x548   :  { %2463 = vmatpush3.xpose.msra.mxu0 %v1754_v23 }
 0x549   :  { %2464 = vmatprep.subr.mxu0 %v2491_v52 }
 0x54c   :  { %2465 = vmatpush3.xpose.msra.mxu0 %v1753_v9 }
 0x54d   :  { %2466 = vmatprep.subr.mxu0 %v2491_v52 }
 0x550   :  { %2467 = vmatpush3.xpose.msra.mxu0 %v1752_v57 }
 0x551   :  { %2468 = vmatprep.subr.mxu0 %v2491_v52 }
 0x554   :  { %2469 = vmatpush3.xpose.msra.mxu0 %v1751_v56 }
 0x555   :  { %2470 = vmatprep.subr.mxu0 %v2491_v52 }
 0x558   :  { %2471 = vmatpush3.xpose.msra.mxu0 %v1750_v59 }
 0x559   :  { %2472 = vmatprep.subr.mxu0 %v2491_v52 }
 0x55c   :  { %2473 = vmatpush3.xpose.msra.mxu0 %v3364_v47 }
 0x55d   :  { %2474 = vmatprep.subr.mxu0 %v2491_v52 }
 0x560   :  { %2475 = vmatpush3.xpose.msra.mxu0 %v1748_v54 }
 0x561   :  { %2476 = vmatprep.subr.mxu0 %v2491_v52 }
 0x564   :  { %2477 = vmatpush3.xpose.msra.mxu0 %v3360_v25 }
 0x565   :  { %2478 = vmatprep.subr.mxu0 %v2491_v52 }
 0x568   :  { %2479 = vmatpush3.xpose.msra.mxu0 %v3362_v38 }
 0x56b   :  { %2481 = vmatmul.mubr.f32.vlgmr.msra.gmra.mxu0 %v2490_v35 }
 0x62b   :  { %v1828_v5 = vpop.f32.mrf.mxu0 }
 0x62c   :  { %1832 = vst [vmem:[%s3401_s13] sm:$0x1] %v1828_v5 }
 0x62d   :  { %v2482_v11 = vpop.f32.mrf.mxu0 }

</bundles_post_ra>
